<compile_context>
chip_gen: v6e
topology: v6e:2x2x1
jax: 0.10.0
libtpu: 0.0.40
codegen_flags: <defaults>
</compile_context>

<pallas_src>
import math
import functools

import jax
import jax.numpy as jnp
from jax.experimental import pallas as pl
from jax.experimental.pallas import tpu as pltpu


# ----------------------------- small helpers -------------------------------------------

def _layernorm(x, w, b, eps=1e-5):
    mu = jnp.mean(x, axis=-1, keepdims=True)
    var = jnp.mean((x - mu) ** 2, axis=-1, keepdims=True)
    return (x - mu) * jax.lax.rsqrt(var + eps) * w + b


def _gelu_tanh(x):
    # PyTorch nn.GELU(approximate='tanh')
    c = math.sqrt(2.0 / math.pi)
    return 0.5 * x * (1.0 + jnp.tanh(c * (x + 0.044715 * x * x * x)))


def _tile(dim, prefs=(512, 256, 128, 64, 32, 16, 8)):
    """Largest preferred tile dividing `dim` (multiples of 8/256 preferred for the
    MXU); falls back to the full dim, which always satisfies the Mosaic block rule."""
    for t in prefs:
        if dim >= t and dim % t == 0:
            return t
    return dim


def _default_vmem_limit():
    """~75% of physical VMEM (128 MiB on v5e/v6e, 64 MiB on v7x), clamped."""
    try:
        cap = int(pltpu.get_tpu_info().vmem_capacity_bytes)
    except Exception:
        cap = 64 * 1024 * 1024
    return max(32 * 1024 * 1024, min(cap * 3 // 4, 112 * 1024 * 1024))


# ----------------------------- Kernel 1: LN1 + QKV projection --------------------------

def ln_qkv_kernel(x_ref,      # (1, TQ, C) f32
                  ln1_ref,    # (2, C)     f32  rows: ln1_w, ln1_b
                  bqkv_ref,   # (3, C)     f32  rows: b_q*scale, b_k, b_v
                  wq_ref,     # (C, C)     bf16 (pre-scaled by 1/sqrt(hd))
                  wk_ref,     # (C, C)     bf16
                  wv_ref,     # (C, C)     bf16
                  q_ref, k_ref, v_ref):   # (1, TQ, C) bf16 each
    f32 = jnp.float32
    x = x_ref[0]
    h = _layernorm(x, ln1_ref[0], ln1_ref[1]).astype(jnp.bfloat16)
    q_ref[0] = (jnp.dot(h, wq_ref[...], preferred_element_type=f32)
                + bqkv_ref[0]).astype(q_ref.dtype)
    k_ref[0] = (jnp.dot(h, wk_ref[...], preferred_element_type=f32)
                + bqkv_ref[1]).astype(k_ref.dtype)
    v_ref[0] = (jnp.dot(h, wv_ref[...], preferred_element_type=f32)
                + bqkv_ref[2]).astype(v_ref.dtype)


# ----------------------------- Kernel 2: flash attention (causal) ----------------------

def flash_attn_kernel(q_ref,   # (1, H, TQ, hd) bf16 (already scaled)
                      k_ref,   # (1, H, TK, hd) bf16
                      v_ref,   # (1, H, TK, hd) bf16
                      y_ref,   # (1, H, TQ, hd) bf16
                      m_ref, l_ref, acc_ref):   # scratch f32
    f32 = jnp.float32
    bf16 = jnp.bfloat16
    qi = pl.program_id(1)
    ki = pl.program_id(2)
    nk = pl.num_programs(2)
    TQ = q_ref.shape[2]
    TK = k_ref.shape[2]

    @pl.when(ki == 0)
    def _():
        m_ref[...] = jnp.full(m_ref.shape, -jnp.inf, f32)
        l_ref[...] = jnp.zeros(l_ref.shape, f32)
        acc_ref[...] = jnp.zeros(acc_ref.shape, f32)

    # Causal block skip: TQ == TK, so the block is fully masked iff ki > qi.
    @pl.when(ki <= qi)
    def _():
        q = q_ref[0]                                   # (H, TQ, hd)
        k = k_ref[0]
        v = v_ref[0]
        s = jnp.einsum('hqd,hkd->hqk', q, k,
                       preferred_element_type=f32)     # (H, TQ, TK)
        row = qi * TQ + jax.lax.broadcasted_iota(jnp.int32, (TQ, TK), 0)
        col = ki * TK + jax.lax.broadcasted_iota(jnp.int32, (TQ, TK), 1)
        s = jnp.where(col <= row, s, -1e30)

        m_prev = m_ref[...]
        m_new = jnp.maximum(m_prev, jnp.max(s, axis=-1, keepdims=True))
        alpha = jnp.exp(m_prev - m_new)
        # TODO(synk): on v6e/v7x compute exp in bf16 (2x EUP rate); kept f32 (v5e-safe).
        p = jnp.exp(s - m_new)
        l_ref[...] = alpha * l_ref[...] + jnp.sum(p, axis=-1, keepdims=True)
        acc_ref[...] = alpha * acc_ref[...] + jnp.einsum(
            'hqk,hkd->hqd', p.astype(bf16), v, preferred_element_type=f32)
        m_ref[...] = m_new

    @pl.when(ki == nk - 1)
    def _():
        y = acc_ref[...] * pl.reciprocal(l_ref[...], approx=True)
        y_ref[0] = y.astype(y_ref.dtype)


# ----------------------------- Kernel 3: out-proj + residual + LN2 + MLP ---------------

def proj_mlp_kernel(y_ref,        # (TM, C)  bf16  merged attention heads
                    x_ref,        # (TM, C)  f32   original residual input
                    ln2_ref,      # (2, C)   f32   rows: ln2_w, ln2_b
                    bvec_ref,     # (2, C)   f32   rows: b_ao, b_pr
                    bfc_ref,      # (1, CH)  f32   b_fc chunk
                    wao_ref,      # (C, C)   bf16
                    wfc_ref,      # (C, CH)  bf16  w_fc chunk
                    wpr_ref,      # (CH, C)  bf16  w_pr chunk
                    o_ref,        # (TM, C)  f32
                    xr_ref, hln_ref, acc_ref):   # scratch: f32, bf16, f32
    f32 = jnp.float32
    j = pl.program_id(1)
    nj = pl.num_programs(1)

    @pl.when(j == 0)
    def _():
        xr = x_ref[...] + (jnp.dot(y_ref[...], wao_ref[...],
                                   preferred_element_type=f32) + bvec_ref[0])
        xr_ref[...] = xr                                   # residual 1
        hln_ref[...] = _layernorm(xr, ln2_ref[0], ln2_ref[1]).astype(hln_ref.dtype)
        acc_ref[...] = jnp.zeros(acc_ref.shape, f32)

    z = jnp.dot(hln_ref[...], wfc_ref[...], preferred_element_type=f32) + bfc_ref[...]
    z = _gelu_tanh(z).astype(jnp.bfloat16)                 # f32 GELU (v5e-safe)
    acc_ref[...] += jnp.dot(z, wpr_ref[...], preferred_element_type=f32)

    @pl.when(j == nj - 1)
    def _():
        o_ref[...] = xr_ref[...] + acc_ref[...] + bvec_ref[1]   # residual 2


# ----------------------------- wrapper --------------------------------------------------

def prepare_params(params, n_head):
    """One-time prep: split/scale QKV, pack small vectors, cast matmul weights to bf16."""
    C = params["ln1_w"].shape[0]
    hd = C // n_head
    scale = 1.0 / math.sqrt(hd)
    bf16 = jnp.bfloat16
    w_qkv, b_qkv = params["w_qkv"], params["b_qkv"]
    w_q, w_k, w_v = w_qkv[:, :C], w_qkv[:, C:2 * C], w_qkv[:, 2 * C:]
    b_q, b_k, b_v = b_qkv[:C], b_qkv[C:2 * C], b_qkv[2 * C:]
    return {
        "ln1": jnp.stack([params["ln1_w"], params["ln1_b"]]),          # (2, C)
        "ln2": jnp.stack([params["ln2_w"], params["ln2_b"]]),          # (2, C)
        "b_qkv": jnp.stack([b_q * scale, b_k, b_v]),                   # (3, C)
        "b_ao_pr": jnp.stack([params["b_ao"], params["b_pr"]]),        # (2, C)
        "b_fc": params["b_fc"][None, :],                               # (1, 4C)
        "w_q": (w_q * scale).astype(bf16),
        "w_k": w_k.astype(bf16),
        "w_v": w_v.astype(bf16),
        "w_ao": params["w_ao"].astype(bf16),
        "w_fc": params["w_fc"].astype(bf16),
        "w_pr": params["w_pr"].astype(bf16),
    }


def transformer_block(x, prep, *, n_head):
    """x: (B, T, C) float32. prep: output of prepare_params (bf16 weights)."""
    B, T, C = x.shape
    H = n_head
    hd = C // H
    f32, bf16 = jnp.float32, jnp.bfloat16

    TQ = _tile(T)                 # query/key tile (TK == TQ)
    TM = _tile(B * T)             # row tile for the MLP kernel
    hidden = 4 * C
    CH = _tile(hidden, (512, 256, 128))
    vmem_limit = _default_vmem_limit()

    # ---- K1: LN1 + QKV projection --------------------------------------------------
    q, k, v = pl.pallas_call(
        ln_qkv_kernel,
        out_shape=(jax.ShapeDtypeStruct((B, T, C), bf16),
                   jax.ShapeDtypeStruct((B, T, C), bf16),
                   jax.ShapeDtypeStruct((B, T, C), bf16)),
        grid_spec=pltpu.PrefetchScalarGridSpec(
            num_scalar_prefetch=0,
            grid=(B, T // TQ),
            in_specs=[
                pl.BlockSpec((1, TQ, C), lambda b, i: (b, i, 0)),
                pl.BlockSpec((2, C), lambda b, i: (0, 0)),
                pl.BlockSpec((3, C), lambda b, i: (0, 0)),
                pl.BlockSpec((C, C), lambda b, i: (0, 0)),
                pl.BlockSpec((C, C), lambda b, i: (0, 0)),
                pl.BlockSpec((C, C), lambda b, i: (0, 0)),
            ],
            out_specs=(
                pl.BlockSpec((1, TQ, C), lambda b, i: (b, i, 0)),
                pl.BlockSpec((1, TQ, C), lambda b, i: (b, i, 0)),
                pl.BlockSpec((1, TQ, C), lambda b, i: (b, i, 0)),
            ),
        ),
        compiler_params=pltpu.CompilerParams(
            dimension_semantics=("parallel", "parallel"),
            vmem_limit_bytes=vmem_limit),
    )(x, prep["ln1"], prep["b_qkv"], prep["w_q"], prep["w_k"], prep["w_v"])

    # Single reshape+transpose per tensor (layout plumbing, fused under jit).
    def to_heads(a):
        return a.reshape(B, T, H, hd).transpose(0, 2, 1, 3)   # (B, H, T, hd)

    qh, kh, vh = to_heads(q), to_heads(k), to_heads(v)

    # ---- K2: flash attention with online softmax + causal block skipping -----------
    nq = T // TQ
    y = pl.pallas_call(
        flash_attn_kernel,
        out_shape=jax.ShapeDtypeStruct((B, H, T, hd), bf16),
        grid_spec=pltpu.PrefetchScalarGridSpec(
            num_scalar_prefetch=0,
            grid=(B, nq, nq),
            in_specs=[
                pl.BlockSpec((1, H, TQ, hd), lambda b, i, j: (b, 0, i, 0)),
                # clamp skipped KV blocks to the diagonal block -> no redundant DMA
                pl.BlockSpec((1, H, TQ, hd),
                             lambda b, i, j: (b, 0, jnp.minimum(j, i), 0)),
                pl.BlockSpec((1, H, TQ, hd),
                             lambda b, i, j: (b, 0, jnp.minimum(j, i), 0)),
            ],
            out_specs=pl.BlockSpec((1, H, TQ, hd), lambda b, i, j: (b, 0, i, 0)),
            scratch_shapes=[
                pltpu.VMEM((H, TQ, 1), f32),    # m
                pltpu.VMEM((H, TQ, 1), f32),    # l
                pltpu.VMEM((H, TQ, hd), f32),   # acc
            ],
        ),
        compiler_params=pltpu.CompilerParams(
            dimension_semantics=("parallel", "parallel", "arbitrary"),
            vmem_limit_bytes=vmem_limit),
    )(qh, kh, vh)

    # merge heads back to (B*T, C)
    y2 = y.transpose(0, 2, 1, 3).reshape(B * T, C)
    x2 = x.reshape(B * T, C)
    N = B * T

    # ---- K3: attention out-proj + residual + LN2 + MLP (4C streamed in chunks) -----
    out = pl.pallas_call(
        proj_mlp_kernel,
        out_shape=jax.ShapeDtypeStruct((N, C), f32),
        grid_spec=pltpu.PrefetchScalarGridSpec(
            num_scalar_prefetch=0,
            grid=(N // TM, hidden // CH),
            in_specs=[
                pl.BlockSpec((TM, C), lambda i, j: (i, 0)),    # y (attn heads merged)
                pl.BlockSpec((TM, C), lambda i, j: (i, 0)),    # x (residual)
                pl.BlockSpec((2, C), lambda i, j: (0, 0)),     # ln2
                pl.BlockSpec((2, C), lambda i, j: (0, 0)),     # b_ao / b_pr
                pl.BlockSpec((1, CH), lambda i, j: (0, j)),    # b_fc chunk
                pl.BlockSpec((C, C), lambda i, j: (0, 0)),     # w_ao
                pl.BlockSpec((C, CH), lambda i, j: (0, j)),    # w_fc chunk (streamed)
                pl.BlockSpec((CH, C), lambda i, j: (j, 0)),    # w_pr chunk (streamed)
            ],
            out_specs=pl.BlockSpec((TM, C), lambda i, j: (i, 0)),
            scratch_shapes=[
                pltpu.VMEM((TM, C), f32),    # xr  (post-attention residual)
                pltpu.VMEM((TM, C), bf16),   # hln (LN2 output, reused across chunks)
                pltpu.VMEM((TM, C), f32),    # acc (MLP accumulator)
            ],
        ),
        compiler_params=pltpu.CompilerParams(
            dimension_semantics=("parallel", "arbitrary"),
            vmem_limit_bytes=vmem_limit),
    )(y2, x2, prep["ln2"], prep["b_ao_pr"], prep["b_fc"],
      prep["w_ao"], prep["w_fc"], prep["w_pr"])

    return out.reshape(B, T, C)


# ----------------------------- deterministic parameter init ---------------------------

def init_params(key, C):
    ks = jax.random.split(key, 8)
    std = 0.02
    return {
        "ln1_w": jnp.ones((C,), jnp.float32),
        "ln1_b": jnp.zeros((C,), jnp.float32),
        "w_qkv": std * jax.random.normal(ks[0], (C, 3 * C), jnp.float32),
        "b_qkv": std * jax.random.normal(ks[1], (3 * C,), jnp.float32),
        "w_ao":  std * jax.random.normal(ks[2], (C, C), jnp.float32),
        "b_ao":  std * jax.random.normal(ks[3], (C,), jnp.float32),
        "ln2_w": jnp.ones((C,), jnp.float32),
        "ln2_b": jnp.zeros((C,), jnp.float32),
        "w_fc":  std * jax.random.normal(ks[4], (C, 4 * C), jnp.float32),
        "b_fc":  std * jax.random.normal(ks[5], (4 * C,), jnp.float32),
        "w_pr":  std * jax.random.normal(ks[6], (4 * C, C), jnp.float32),
        "b_pr":  std * jax.random.normal(ks[7], (C,), jnp.float32),
    }


# ----------------------------- pure-JAX f32 reference (for sanity) --------------------

def reference_block(x, p, n_head):
    B, T, C = x.shape
    hd = C // n_head

    def ln(v, w, b):
        mu = jnp.mean(v, -1, keepdims=True)
        var = jnp.mean((v - mu) ** 2, -1, keepdims=True)
        return (v - mu) * jax.lax.rsqrt(var + 1e-5) * w + b

    h = ln(x, p["ln1_w"], p["ln1_b"])
    qkv = h @ p["w_qkv"] + p["b_qkv"]
    q, k, v = jnp.split(qkv, 3, axis=-1)
    q = q.reshape(B, T, n_head, hd).transpose(0, 2, 1, 3)
    k = k.reshape(B, T, n_head, hd).transpose(0, 2, 1, 3)
    v = v.reshape(B, T, n_head, hd).transpose(0, 2, 1, 3)
    s = jnp.einsum("bhtd,bhsd->bhts", q, k) / math.sqrt(hd)
    mask = jnp.tril(jnp.ones((T, T), bool))
    s = jnp.where(mask, s, -jnp.inf)
    a = jax.nn.softmax(s, axis=-1)
    y = jnp.einsum("bhts,bhsd->bhtd", a, v).transpose(0, 2, 1, 3).reshape(B, T, C)
    x = x + (y @ p["w_ao"] + p["b_ao"])

    h = ln(x, p["ln2_w"], p["ln2_b"])
    h = h @ p["w_fc"] + p["b_fc"]
    h = 0.5 * h * (1.0 + jnp.tanh(math.sqrt(2.0 / math.pi) * (h + 0.044715 * h ** 3)))
    x = x + (h @ p["w_pr"] + p["b_pr"])
    return x


# ----------------------------- main ----------------------------------------------------

if __name__ == "__main__":
    B, T, C, n_head = 2, 8, 32, 4   # small GPT config: n_embd=32, n_head=4, seq=8

    key = jax.random.PRNGKey(0)
    k_x, k_p = jax.random.split(key)
    x = jax.random.normal(k_x, (B, T, C), jnp.float32)
    params = init_params(k_p, C)

    prep = prepare_params(params, n_head)       # one-time bf16 weight prep (hoisted)
    block_fn = jax.jit(functools.partial(transformer_block, n_head=n_head))

    out = block_fn(x, prep)
    out = jax.block_until_ready(out)

    ref = reference_block(x, params, n_head)
    assert out.shape == (B, T, C)
    max_err = float(jnp.max(jnp.abs(out - ref)))
    # tolerance widened vs the pure-f32 reference: bf16 MXU matmuls (f32 accumulation),
    # bf16 q/k/v/y interchange, and an approximate EUP reciprocal in the softmax.
    assert jnp.allclose(out, ref, atol=2e-2, rtol=2e-2), f"mismatch vs reference (max|d|={max_err})"

    print("KERNEL_OK")
</pallas_src>

<mosaic_0001>
module attributes {stable_mosaic.version = 11 : i64} {
  func.func @ln_qkv_kernel(%arg0: i32, %arg1: i32, %arg2: memref<1x8x32xf32, #tpu.memory_space<vmem>>, %arg3: memref<2x32xf32, #tpu.memory_space<vmem>>, %arg4: memref<3x32xf32, #tpu.memory_space<vmem>>, %arg5: memref<32x32xbf16, #tpu.memory_space<vmem>>, %arg6: memref<32x32xbf16, #tpu.memory_space<vmem>>, %arg7: memref<32x32xbf16, #tpu.memory_space<vmem>>, %arg8: memref<1x8x32xbf16, #tpu.memory_space<vmem>>, %arg9: memref<1x8x32xbf16, #tpu.memory_space<vmem>>, %arg10: memref<1x8x32xbf16, #tpu.memory_space<vmem>>) attributes {dimension_semantics = [#tpu.dimension_semantics<parallel>, #tpu.dimension_semantics<parallel>], iteration_bounds = array<i64: 2, 1>, scalar_prefetch = 0 : i64, scratch_operands = 0 : i64, tpu.core_type = #tpu.core_type<tc>, window_params = [{transform_indices = @transform_0, window_bounds = array<i64: 1, 8, 32>}, {pipeline_mode = #tpu.pipeline_mode<synchronous>, transform_indices = @transform_1, window_bounds = array<i64: 2, 32>}, {pipeline_mode = #tpu.pipeline_mode<synchronous>, transform_indices = @transform_2, window_bounds = array<i64: 3, 32>}, {pipeline_mode = #tpu.pipeline_mode<synchronous>, transform_indices = @transform_3, window_bounds = array<i64: 32, 32>}, {pipeline_mode = #tpu.pipeline_mode<synchronous>, transform_indices = @transform_4, window_bounds = array<i64: 32, 32>}, {pipeline_mode = #tpu.pipeline_mode<synchronous>, transform_indices = @transform_5, window_bounds = array<i64: 32, 32>}, {transform_indices = @transform_6, window_bounds = array<i64: 1, 8, 32>}, {transform_indices = @transform_7, window_bounds = array<i64: 1, 8, 32>}, {transform_indices = @transform_8, window_bounds = array<i64: 1, 8, 32>}]} {
    %c0 = arith.constant 0 : index
    %c0_0 = arith.constant 0 : index
    %c0_1 = arith.constant 0 : index
    %0 = vector.load %arg2[%c0, %c0_0, %c0_1] : memref<1x8x32xf32, #tpu.memory_space<vmem>>, vector<1x8x32xf32>
    %1 = vector.shape_cast %0 : vector<1x8x32xf32> to vector<8x32xf32>
    %c0_2 = arith.constant 0 : index
    %c0_3 = arith.constant 0 : index
    %2 = vector.load %arg3[%c0_2, %c0_3] : memref<2x32xf32, #tpu.memory_space<vmem>>, vector<1x32xf32>
    %3 = vector.shape_cast %2 : vector<1x32xf32> to vector<32xf32>
    %c1 = arith.constant 1 : index
    %c0_4 = arith.constant 0 : index
    %4 = vector.load %arg3[%c1, %c0_4] : memref<2x32xf32, #tpu.memory_space<vmem>>, vector<1x32xf32>
    %5 = vector.shape_cast %4 : vector<1x32xf32> to vector<32xf32>
    %cst = arith.constant dense<0.000000e+00> : vector<8xf32>
    %6 = vector.multi_reduction <add>, %1, %cst [1] : vector<8x32xf32> to vector<8xf32>
    %7 = vector.shape_cast %6 : vector<8xf32> to vector<8x1xf32>
    %cst_5 = arith.constant 3.200000e+01 : f32
    %8 = vector.broadcast %cst_5 : f32 to vector<8x1xf32>
    %9 = arith.divf %7, %8 : vector<8x1xf32>
    %10 = vector.broadcast %9 : vector<8x1xf32> to vector<8x32xf32>
    %11 = arith.subf %1, %10 : vector<8x32xf32>
    %12 = arith.mulf %11, %11 : vector<8x32xf32>
    %cst_6 = arith.constant dense<0.000000e+00> : vector<8xf32>
    %13 = vector.multi_reduction <add>, %12, %cst_6 [1] : vector<8x32xf32> to vector<8xf32>
    %14 = vector.shape_cast %13 : vector<8xf32> to vector<8x1xf32>
    %cst_7 = arith.constant 3.200000e+01 : f32
    %15 = vector.broadcast %cst_7 : f32 to vector<8x1xf32>
    %16 = arith.divf %14, %15 : vector<8x1xf32>
    %17 = vector.broadcast %9 : vector<8x1xf32> to vector<8x32xf32>
    %18 = arith.subf %1, %17 : vector<8x32xf32>
    %cst_8 = arith.constant 9.99999974E-6 : f32
    %19 = vector.broadcast %cst_8 : f32 to vector<8x1xf32>
    %20 = arith.addf %16, %19 : vector<8x1xf32>
    %21 = math.rsqrt %20 : vector<8x1xf32>
    %22 = vector.broadcast %21 : vector<8x1xf32> to vector<8x32xf32>
    %23 = arith.mulf %18, %22 : vector<8x32xf32>
    %24 = vector.shape_cast %3 : vector<32xf32> to vector<1x32xf32>
    %25 = vector.broadcast %24 : vector<1x32xf32> to vector<8x32xf32>
    %26 = arith.mulf %23, %25 : vector<8x32xf32>
    %27 = vector.shape_cast %5 : vector<32xf32> to vector<1x32xf32>
    %28 = vector.broadcast %27 : vector<1x32xf32> to vector<8x32xf32>
    %29 = arith.addf %26, %28 : vector<8x32xf32>
    %30 = arith.truncf %29 : vector<8x32xf32> to vector<8x32xbf16>
    %c0_9 = arith.constant 0 : index
    %c0_10 = arith.constant 0 : index
    %31 = vector.load %arg5[%c0_9, %c0_10] : memref<32x32xbf16, #tpu.memory_space<vmem>>, vector<32x32xbf16>
    %cst_11 = arith.constant dense<0.000000e+00> : vector<8x32xf32>
    %32 = tpu.matmul %30, %31, %cst_11 {dimension_numbers = #tpu.dot_dimension_numbers<[1], [0], [0], [1], [0, 0, 1, 1], [], []>} : vector<8x32xbf16>, vector<32x32xbf16>, vector<8x32xf32> -> vector<8x32xf32>
    %c0_12 = arith.constant 0 : index
    %c0_13 = arith.constant 0 : index
    %33 = vector.load %arg4[%c0_12, %c0_13] : memref<3x32xf32, #tpu.memory_space<vmem>>, vector<1x32xf32>
    %34 = vector.shape_cast %33 : vector<1x32xf32> to vector<32xf32>
    %35 = vector.shape_cast %34 : vector<32xf32> to vector<1x32xf32>
    %36 = vector.broadcast %35 : vector<1x32xf32> to vector<8x32xf32>
    %37 = arith.addf %32, %36 : vector<8x32xf32>
    %38 = arith.truncf %37 : vector<8x32xf32> to vector<8x32xbf16>
    %c0_14 = arith.constant 0 : index
    %c0_15 = arith.constant 0 : index
    %c0_16 = arith.constant 0 : index
    %39 = vector.load %arg8[%c0_14, %c0_15, %c0_16] : memref<1x8x32xbf16, #tpu.memory_space<vmem>>, vector<1x8x32xbf16>
    %40 = vector.shape_cast %39 : vector<1x8x32xbf16> to vector<8x32xbf16>
    %41 = vector.shape_cast %38 : vector<8x32xbf16> to vector<1x8x32xbf16>
    tpu.vector_store %arg8[%c0_14, %c0_15, %c0_16], %41 {strides = array<i32>} : memref<1x8x32xbf16, #tpu.memory_space<vmem>>, vector<1x8x32xbf16>,
    %c0_17 = arith.constant 0 : index
    %c0_18 = arith.constant 0 : index
    %42 = vector.load %arg6[%c0_17, %c0_18] : memref<32x32xbf16, #tpu.memory_space<vmem>>, vector<32x32xbf16>
    %cst_19 = arith.constant dense<0.000000e+00> : vector<8x32xf32>
    %43 = tpu.matmul %30, %42, %cst_19 {dimension_numbers = #tpu.dot_dimension_numbers<[1], [0], [0], [1], [0, 0, 1, 1], [], []>} : vector<8x32xbf16>, vector<32x32xbf16>, vector<8x32xf32> -> vector<8x32xf32>
    %c1_20 = arith.constant 1 : index
    %c0_21 = arith.constant 0 : index
    %44 = vector.load %arg4[%c1_20, %c0_21] : memref<3x32xf32, #tpu.memory_space<vmem>>, vector<1x32xf32>
    %45 = vector.shape_cast %44 : vector<1x32xf32> to vector<32xf32>
    %46 = vector.shape_cast %45 : vector<32xf32> to vector<1x32xf32>
    %47 = vector.broadcast %46 : vector<1x32xf32> to vector<8x32xf32>
    %48 = arith.addf %43, %47 : vector<8x32xf32>
    %49 = arith.truncf %48 : vector<8x32xf32> to vector<8x32xbf16>
    %c0_22 = arith.constant 0 : index
    %c0_23 = arith.constant 0 : index
    %c0_24 = arith.constant 0 : index
    %50 = vector.load %arg9[%c0_22, %c0_23, %c0_24] : memref<1x8x32xbf16, #tpu.memory_space<vmem>>, vector<1x8x32xbf16>
    %51 = vector.shape_cast %50 : vector<1x8x32xbf16> to vector<8x32xbf16>
    %52 = vector.shape_cast %49 : vector<8x32xbf16> to vector<1x8x32xbf16>
    tpu.vector_store %arg9[%c0_22, %c0_23, %c0_24], %52 {strides = array<i32>} : memref<1x8x32xbf16, #tpu.memory_space<vmem>>, vector<1x8x32xbf16>,
    %c0_25 = arith.constant 0 : index
    %c0_26 = arith.constant 0 : index
    %53 = vector.load %arg7[%c0_25, %c0_26] : memref<32x32xbf16, #tpu.memory_space<vmem>>, vector<32x32xbf16>
    %cst_27 = arith.constant dense<0.000000e+00> : vector<8x32xf32>
    %54 = tpu.matmul %30, %53, %cst_27 {dimension_numbers = #tpu.dot_dimension_numbers<[1], [0], [0], [1], [0, 0, 1, 1], [], []>} : vector<8x32xbf16>, vector<32x32xbf16>, vector<8x32xf32> -> vector<8x32xf32>
    %c2 = arith.constant 2 : index
    %c0_28 = arith.constant 0 : index
    %55 = vector.load %arg4[%c2, %c0_28] : memref<3x32xf32, #tpu.memory_space<vmem>>, vector<1x32xf32>
    %56 = vector.shape_cast %55 : vector<1x32xf32> to vector<32xf32>
    %57 = vector.shape_cast %56 : vector<32xf32> to vector<1x32xf32>
    %58 = vector.broadcast %57 : vector<1x32xf32> to vector<8x32xf32>
    %59 = arith.addf %54, %58 : vector<8x32xf32>
    %60 = arith.truncf %59 : vector<8x32xf32> to vector<8x32xbf16>
    %c0_29 = arith.constant 0 : index
    %c0_30 = arith.constant 0 : index
    %c0_31 = arith.constant 0 : index
    %61 = vector.load %arg10[%c0_29, %c0_30, %c0_31] : memref<1x8x32xbf16, #tpu.memory_space<vmem>>, vector<1x8x32xbf16>
    %62 = vector.shape_cast %61 : vector<1x8x32xbf16> to vector<8x32xbf16>
    %63 = vector.shape_cast %60 : vector<8x32xbf16> to vector<1x8x32xbf16>
    tpu.vector_store %arg10[%c0_29, %c0_30, %c0_31], %63 {strides = array<i32>} : memref<1x8x32xbf16, #tpu.memory_space<vmem>>, vector<1x8x32xbf16>,
    return
  }
  func.func @transform_0(%arg0: i32, %arg1: i32) -> (i32, i32, i32) {
    %c0_i32 = arith.constant 0 : i32
    %c0_i32_0 = arith.constant 0 : i32
    return %arg0, %arg1, %c0_i32 : i32, i32, i32
  }
  func.func @transform_1(%arg0: i32, %arg1: i32) -> (i32, i32) {
    %c0_i32 = arith.constant 0 : i32
    %c0_i32_0 = arith.constant 0 : i32
    %c0_i32_1 = arith.constant 0 : i32
    return %c0_i32, %c0_i32_0 : i32, i32
  }
  func.func @transform_2(%arg0: i32, %arg1: i32) -> (i32, i32) {
    %c0_i32 = arith.constant 0 : i32
    %c0_i32_0 = arith.constant 0 : i32
    %c0_i32_1 = arith.constant 0 : i32
    return %c0_i32, %c0_i32_0 : i32, i32
  }
  func.func @transform_3(%arg0: i32, %arg1: i32) -> (i32, i32) {
    %c0_i32 = arith.constant 0 : i32
    %c0_i32_0 = arith.constant 0 : i32
    %c0_i32_1 = arith.constant 0 : i32
    return %c0_i32, %c0_i32_0 : i32, i32
  }
  func.func @transform_4(%arg0: i32, %arg1: i32) -> (i32, i32) {
    %c0_i32 = arith.constant 0 : i32
    %c0_i32_0 = arith.constant 0 : i32
    %c0_i32_1 = arith.constant 0 : i32
    return %c0_i32, %c0_i32_0 : i32, i32
  }
  func.func @transform_5(%arg0: i32, %arg1: i32) -> (i32, i32) {
    %c0_i32 = arith.constant 0 : i32
    %c0_i32_0 = arith.constant 0 : i32
    %c0_i32_1 = arith.constant 0 : i32
    return %c0_i32, %c0_i32_0 : i32, i32
  }
  func.func @transform_6(%arg0: i32, %arg1: i32) -> (i32, i32, i32) {
    %c0_i32 = arith.constant 0 : i32
    %c0_i32_0 = arith.constant 0 : i32
    return %arg0, %arg1, %c0_i32 : i32, i32, i32
  }
  func.func @transform_7(%arg0: i32, %arg1: i32) -> (i32, i32, i32) {
    %c0_i32 = arith.constant 0 : i32
    %c0_i32_0 = arith.constant 0 : i32
    return %arg0, %arg1, %c0_i32 : i32, i32, i32
  }
  func.func @transform_8(%arg0: i32, %arg1: i32) -> (i32, i32, i32) {
    %c0_i32 = arith.constant 0 : i32
    %c0_i32_0 = arith.constant 0 : i32
    return %arg0, %arg1, %c0_i32 : i32, i32, i32
  }
}

module attributes {stable_mosaic.version = 11 : i64} {
  func.func @flash_attn_kernel(%arg0: i32, %arg1: i32, %arg2: i32, %arg3: memref<1x4x8x8xbf16, #tpu.memory_space<vmem>>, %arg4: memref<1x4x8x8xbf16, #tpu.memory_space<vmem>>, %arg5: memref<1x4x8x8xbf16, #tpu.memory_space<vmem>>, %arg6: memref<1x4x8x8xbf16, #tpu.memory_space<vmem>>, %arg7: memref<4x8x1xf32, #tpu.memory_space<vmem>>, %arg8: memref<4x8x1xf32, #tpu.memory_space<vmem>>, %arg9: memref<4x8x8xf32, #tpu.memory_space<vmem>>) attributes {dimension_semantics = [#tpu.dimension_semantics<parallel>, #tpu.dimension_semantics<parallel>, #tpu.dimension_semantics<arbitrary>], iteration_bounds = array<i64: 2, 1, 1>, scalar_prefetch = 0 : i64, scratch_operands = 3 : i64, tpu.core_type = #tpu.core_type<tc>, window_params = [{transform_indices = @transform_0, window_bounds = array<i64: 1, 4, 8, 8>}, {transform_indices = @transform_1, window_bounds = array<i64: 1, 4, 8, 8>}, {transform_indices = @transform_2, window_bounds = array<i64: 1, 4, 8, 8>}, {transform_indices = @transform_3, window_bounds = array<i64: 1, 4, 8, 8>}]} {
    %c0_i32 = arith.constant 0 : i32
    %0 = arith.cmpi eq, %arg2, %c0_i32 : i32
    %1 = arith.extui %0 : i1 to i32
    %c0_i32_0 = arith.constant 0 : i32
    %2 = arith.cmpi ne, %1, %c0_i32_0 : i32
    scf.if %2 {
      %cst = arith.constant 0xFF800000 : f32
      %9 = vector.broadcast %cst : f32 to vector<4x8x1xf32>
      %c0 = arith.constant 0 : index
      %c0_4 = arith.constant 0 : index
      %c0_5 = arith.constant 0 : index
      %10 = vector.load %arg7[%c0, %c0_4, %c0_5] : memref<4x8x1xf32, #tpu.memory_space<vmem>>, vector<4x8x1xf32>
      tpu.vector_store %arg7[%c0, %c0_4, %c0_5], %9 {strides = array<i32>} : memref<4x8x1xf32, #tpu.memory_space<vmem>>, vector<4x8x1xf32>,
      %cst_6 = arith.constant 0.000000e+00 : f32
      %11 = vector.broadcast %cst_6 : f32 to vector<4x8x1xf32>
      %c0_7 = arith.constant 0 : index
      %c0_8 = arith.constant 0 : index
      %c0_9 = arith.constant 0 : index
      %12 = vector.load %arg8[%c0_7, %c0_8, %c0_9] : memref<4x8x1xf32, #tpu.memory_space<vmem>>, vector<4x8x1xf32>
      tpu.vector_store %arg8[%c0_7, %c0_8, %c0_9], %11 {strides = array<i32>} : memref<4x8x1xf32, #tpu.memory_space<vmem>>, vector<4x8x1xf32>,
      %cst_10 = arith.constant 0.000000e+00 : f32
      %13 = vector.broadcast %cst_10 : f32 to vector<4x8x8xf32>
      %c0_11 = arith.constant 0 : index
      %c0_12 = arith.constant 0 : index
      %c0_13 = arith.constant 0 : index
      %14 = vector.load %arg9[%c0_11, %c0_12, %c0_13] : memref<4x8x8xf32, #tpu.memory_space<vmem>>, vector<4x8x8xf32>
      tpu.vector_store %arg9[%c0_11, %c0_12, %c0_13], %13 {strides = array<i32>} : memref<4x8x8xf32, #tpu.memory_space<vmem>>, vector<4x8x8xf32>,
    } else {
    }
    %3 = arith.cmpi sle, %arg2, %arg1 : i32
    %4 = arith.extui %3 : i1 to i32
    %c0_i32_1 = arith.constant 0 : i32
    %5 = arith.cmpi ne, %4, %c0_i32_1 : i32
    scf.if %5 {
      %c0 = arith.constant 0 : index
      %c0_4 = arith.constant 0 : index
      %c0_5 = arith.constant 0 : index
      %c0_6 = arith.constant 0 : index
      %9 = vector.load %arg3[%c0, %c0_4, %c0_5, %c0_6] : memref<1x4x8x8xbf16, #tpu.memory_space<vmem>>, vector<1x4x8x8xbf16>
      %10 = vector.shape_cast %9 : vector<1x4x8x8xbf16> to vector<4x8x8xbf16>
      %c0_7 = arith.constant 0 : index
      %c0_8 = arith.constant 0 : index
      %c0_9 = arith.constant 0 : index
      %c0_10 = arith.constant 0 : index
      %11 = vector.load %arg4[%c0_7, %c0_8, %c0_9, %c0_10] : memref<1x4x8x8xbf16, #tpu.memory_space<vmem>>, vector<1x4x8x8xbf16>
      %12 = vector.shape_cast %11 : vector<1x4x8x8xbf16> to vector<4x8x8xbf16>
      %c0_11 = arith.constant 0 : index
      %c0_12 = arith.constant 0 : index
      %c0_13 = arith.constant 0 : index
      %c0_14 = arith.constant 0 : index
      %13 = vector.load %arg5[%c0_11, %c0_12, %c0_13, %c0_14] : memref<1x4x8x8xbf16, #tpu.memory_space<vmem>>, vector<1x4x8x8xbf16>
      %14 = vector.shape_cast %13 : vector<1x4x8x8xbf16> to vector<4x8x8xbf16>
      "tpu.trace_start"() <{level = 10 : i32, message = "hqd,hkd->hqk"}> : () -> ()
      %cst = arith.constant dense<0.000000e+00> : vector<4x8x8xf32>
      %15 = tpu.matmul %10, %12, %cst {dimension_numbers = #tpu.dot_dimension_numbers<[2], [2], [1], [1], [0, 0, 0, 1, 1, 1], [0], [0]>} : vector<4x8x8xbf16>, vector<4x8x8xbf16>, vector<4x8x8xf32> -> vector<4x8x8xf32>
      "tpu.trace_stop"() : () -> ()
      %c8_i32 = arith.constant 8 : i32
      %16 = arith.muli %arg1, %c8_i32 : i32
      %17 = tpu.iota {dimensions = array<i32: 0>} : vector<8x8xi32>
      %18 = vector.broadcast %16 : i32 to vector<8x8xi32>
      %19 = arith.addi %18, %17 : vector<8x8xi32>
      %c8_i32_15 = arith.constant 8 : i32
      %20 = arith.muli %arg2, %c8_i32_15 : i32
      %21 = tpu.iota {dimensions = array<i32: 1>} : vector<8x8xi32>
      %22 = vector.broadcast %20 : i32 to vector<8x8xi32>
      %23 = arith.addi %22, %21 : vector<8x8xi32>
      %24 = arith.cmpi sle, %23, %19 : vector<8x8xi32>
      %cst_16 = arith.constant -1.000000e+30 : f32
      %25 = vector.shape_cast %24 : vector<8x8xi1> to vector<1x8x8xi1>
      %26 = vector.broadcast %25 : vector<1x8x8xi1> to vector<4x8x8xi1>
      %27 = vector.broadcast %cst_16 : f32 to vector<4x8x8xf32>
      %28 = arith.select %26, %15, %27 : vector<4x8x8xi1>, vector<4x8x8xf32>
      %c0_17 = arith.constant 0 : index
      %c0_18 = arith.constant 0 : index
      %c0_19 = arith.constant 0 : index
      %29 = vector.load %arg7[%c0_17, %c0_18, %c0_19] : memref<4x8x1xf32, #tpu.memory_space<vmem>>, vector<4x8x1xf32>
      %cst_20 = arith.constant dense<0xFF800000> : vector<4x8xf32>
      %30 = vector.multi_reduction <maximumf>, %28, %cst_20 [2] : vector<4x8x8xf32> to vector<4x8xf32>
      %31 = vector.shape_cast %30 : vector<4x8xf32> to vector<4x8x1xf32>
      %32 = arith.maximumf %29, %31 : vector<4x8x1xf32>
      %33 = arith.subf %29, %32 : vector<4x8x1xf32>
      %34 = math.exp %33 : vector<4x8x1xf32>
      %35 = vector.broadcast %32 : vector<4x8x1xf32> to vector<4x8x8xf32>
      %36 = arith.subf %28, %35 : vector<4x8x8xf32>
      %37 = math.exp %36 : vector<4x8x8xf32>
      %c0_21 = arith.constant 0 : index
      %c0_22 = arith.constant 0 : index
      %c0_23 = arith.constant 0 : index
      %38 = vector.load %arg8[%c0_21, %c0_22, %c0_23] : memref<4x8x1xf32, #tpu.memory_space<vmem>>, vector<4x8x1xf32>
      %39 = arith.mulf %34, %38 : vector<4x8x1xf32>
      %cst_24 = arith.constant dense<0.000000e+00> : vector<4x8xf32>
      %40 = vector.multi_reduction <add>, %37, %cst_24 [2] : vector<4x8x8xf32> to vector<4x8xf32>
      %41 = vector.shape_cast %40 : vector<4x8xf32> to vector<4x8x1xf32>
      %42 = arith.addf %39, %41 : vector<4x8x1xf32>
      %c0_25 = arith.constant 0 : index
      %c0_26 = arith.constant 0 : index
      %c0_27 = arith.constant 0 : index
      %43 = vector.load %arg8[%c0_25, %c0_26, %c0_27] : memref<4x8x1xf32, #tpu.memory_space<vmem>>, vector<4x8x1xf32>
      tpu.vector_store %arg8[%c0_25, %c0_26, %c0_27], %42 {strides = array<i32>} : memref<4x8x1xf32, #tpu.memory_space<vmem>>, vector<4x8x1xf32>,
      %c0_28 = arith.constant 0 : index
      %c0_29 = arith.constant 0 : index
      %c0_30 = arith.constant 0 : index
      %44 = vector.load %arg9[%c0_28, %c0_29, %c0_30] : memref<4x8x8xf32, #tpu.memory_space<vmem>>, vector<4x8x8xf32>
      %45 = vector.broadcast %34 : vector<4x8x1xf32> to vector<4x8x8xf32>
      %46 = arith.mulf %45, %44 : vector<4x8x8xf32>
      %47 = arith.truncf %37 : vector<4x8x8xf32> to vector<4x8x8xbf16>
      "tpu.trace_start"() <{level = 10 : i32, message = "hqk,hkd->hqd"}> : () -> ()
      %cst_31 = arith.constant dense<0.000000e+00> : vector<4x8x8xf32>
      %48 = tpu.matmul %47, %14, %cst_31 {dimension_numbers = #tpu.dot_dimension_numbers<[2], [1], [1], [2], [0, 0, 0, 1, 1, 2], [0], [0]>} : vector<4x8x8xbf16>, vector<4x8x8xbf16>, vector<4x8x8xf32> -> vector<4x8x8xf32>
      "tpu.trace_stop"() : () -> ()
      %49 = arith.addf %46, %48 : vector<4x8x8xf32>
      %c0_32 = arith.constant 0 : index
      %c0_33 = arith.constant 0 : index
      %c0_34 = arith.constant 0 : index
      %50 = vector.load %arg9[%c0_32, %c0_33, %c0_34] : memref<4x8x8xf32, #tpu.memory_space<vmem>>, vector<4x8x8xf32>
      tpu.vector_store %arg9[%c0_32, %c0_33, %c0_34], %49 {strides = array<i32>} : memref<4x8x8xf32, #tpu.memory_space<vmem>>, vector<4x8x8xf32>,
      %c0_35 = arith.constant 0 : index
      %c0_36 = arith.constant 0 : index
      %c0_37 = arith.constant 0 : index
      %51 = vector.load %arg7[%c0_35, %c0_36, %c0_37] : memref<4x8x1xf32, #tpu.memory_space<vmem>>, vector<4x8x1xf32>
      tpu.vector_store %arg7[%c0_35, %c0_36, %c0_37], %32 {strides = array<i32>} : memref<4x8x1xf32, #tpu.memory_space<vmem>>, vector<4x8x1xf32>,
    } else {
    }
    %c0_i32_2 = arith.constant 0 : i32
    %6 = arith.cmpi eq, %arg2, %c0_i32_2 : i32
    %7 = arith.extui %6 : i1 to i32
    %c0_i32_3 = arith.constant 0 : i32
    %8 = arith.cmpi ne, %7, %c0_i32_3 : i32
    scf.if %8 {
      %c0 = arith.constant 0 : index
      %c0_4 = arith.constant 0 : index
      %c0_5 = arith.constant 0 : index
      %9 = vector.load %arg9[%c0, %c0_4, %c0_5] : memref<4x8x8xf32, #tpu.memory_space<vmem>>, vector<4x8x8xf32>
      %c0_6 = arith.constant 0 : index
      %c0_7 = arith.constant 0 : index
      %c0_8 = arith.constant 0 : index
      %10 = vector.load %arg8[%c0_6, %c0_7, %c0_8] : memref<4x8x1xf32, #tpu.memory_space<vmem>>, vector<4x8x1xf32>
      %11 = tpu.reciprocal %10 {approx = true} : vector<4x8x1xf32> -> vector<4x8x1xf32>
      %12 = vector.broadcast %11 : vector<4x8x1xf32> to vector<4x8x8xf32>
      %13 = arith.mulf %9, %12 : vector<4x8x8xf32>
      %14 = arith.truncf %13 : vector<4x8x8xf32> to vector<4x8x8xbf16>
      %c0_9 = arith.constant 0 : index
      %c0_10 = arith.constant 0 : index
      %c0_11 = arith.constant 0 : index
      %c0_12 = arith.constant 0 : index
      %15 = vector.load %arg6[%c0_9, %c0_10, %c0_11, %c0_12] : memref<1x4x8x8xbf16, #tpu.memory_space<vmem>>, vector<1x4x8x8xbf16>
      %16 = vector.shape_cast %15 : vector<1x4x8x8xbf16> to vector<4x8x8xbf16>
      %17 = vector.shape_cast %14 : vector<4x8x8xbf16> to vector<1x4x8x8xbf16>
      tpu.vector_store %arg6[%c0_9, %c0_10, %c0_11, %c0_12], %17 {strides = array<i32>} : memref<1x4x8x8xbf16, #tpu.memory_space<vmem>>, vector<1x4x8x8xbf16>,
    } else {
    }
    return
  }
  func.func @transform_0(%arg0: i32, %arg1: i32, %arg2: i32) -> (i32, i32, i32, i32) {
    %c0_i32 = arith.constant 0 : i32
    %c0_i32_0 = arith.constant 0 : i32
    %c0_i32_1 = arith.constant 0 : i32
    return %arg0, %c0_i32, %arg1, %c0_i32_0 : i32, i32, i32, i32
  }
  func.func @transform_1(%arg0: i32, %arg1: i32, %arg2: i32) -> (i32, i32, i32, i32) {
    %0 = arith.minsi %arg2, %arg1 : i32
    %c0_i32 = arith.constant 0 : i32
    %c0_i32_0 = arith.constant 0 : i32
    %c0_i32_1 = arith.constant 0 : i32
    return %arg0, %c0_i32, %0, %c0_i32_0 : i32, i32, i32, i32
  }
  func.func @transform_2(%arg0: i32, %arg1: i32, %arg2: i32) -> (i32, i32, i32, i32) {
    %0 = arith.minsi %arg2, %arg1 : i32
    %c0_i32 = arith.constant 0 : i32
    %c0_i32_0 = arith.constant 0 : i32
    %c0_i32_1 = arith.constant 0 : i32
    return %arg0, %c0_i32, %0, %c0_i32_0 : i32, i32, i32, i32
  }
  func.func @transform_3(%arg0: i32, %arg1: i32, %arg2: i32) -> (i32, i32, i32, i32) {
    %c0_i32 = arith.constant 0 : i32
    %c0_i32_0 = arith.constant 0 : i32
    %c0_i32_1 = arith.constant 0 : i32
    return %arg0, %c0_i32, %arg1, %c0_i32_0 : i32, i32, i32, i32
  }
}

module attributes {stable_mosaic.version = 11 : i64} {
  func.func @proj_mlp_kernel(%arg0: i32, %arg1: i32, %arg2: memref<16x32xbf16, #tpu.memory_space<vmem>>, %arg3: memref<16x32xf32, #tpu.memory_space<vmem>>, %arg4: memref<2x32xf32, #tpu.memory_space<vmem>>, %arg5: memref<2x32xf32, #tpu.memory_space<vmem>>, %arg6: memref<1x128xf32, #tpu.memory_space<vmem>>, %arg7: memref<32x32xbf16, #tpu.memory_space<vmem>>, %arg8: memref<32x128xbf16, #tpu.memory_space<vmem>>, %arg9: memref<128x32xbf16, #tpu.memory_space<vmem>>, %arg10: memref<16x32xf32, #tpu.memory_space<vmem>>, %arg11: memref<16x32xf32, #tpu.memory_space<vmem>>, %arg12: memref<16x32xbf16, #tpu.memory_space<vmem>>, %arg13: memref<16x32xf32, #tpu.memory_space<vmem>>) attributes {dimension_semantics = [#tpu.dimension_semantics<parallel>, #tpu.dimension_semantics<arbitrary>], iteration_bounds = array<i64: 1, 1>, scalar_prefetch = 0 : i64, scratch_operands = 3 : i64, tpu.core_type = #tpu.core_type<tc>, window_params = [{transform_indices = @transform_0, window_bounds = array<i64: 16, 32>}, {transform_indices = @transform_1, window_bounds = array<i64: 16, 32>}, {pipeline_mode = #tpu.pipeline_mode<synchronous>, transform_indices = @transform_2, window_bounds = array<i64: 2, 32>}, {pipeline_mode = #tpu.pipeline_mode<synchronous>, transform_indices = @transform_3, window_bounds = array<i64: 2, 32>}, {transform_indices = @transform_4, window_bounds = array<i64: 1, 128>}, {pipeline_mode = #tpu.pipeline_mode<synchronous>, transform_indices = @transform_5, window_bounds = array<i64: 32, 32>}, {transform_indices = @transform_6, window_bounds = array<i64: 32, 128>}, {transform_indices = @transform_7, window_bounds = array<i64: 128, 32>}, {transform_indices = @transform_8, window_bounds = array<i64: 16, 32>}]} {
    %c0_i32 = arith.constant 0 : i32
    %0 = arith.cmpi eq, %arg1, %c0_i32 : i32
    %1 = arith.extui %0 : i1 to i32
    %c0_i32_0 = arith.constant 0 : i32
    %2 = arith.cmpi ne, %1, %c0_i32_0 : i32
    scf.if %2 {
      %c0_19 = arith.constant 0 : index
      %c0_20 = arith.constant 0 : index
      %31 = vector.load %arg3[%c0_19, %c0_20] : memref<16x32xf32, #tpu.memory_space<vmem>>, vector<16x32xf32>
      %c0_21 = arith.constant 0 : index
      %c0_22 = arith.constant 0 : index
      %32 = vector.load %arg2[%c0_21, %c0_22] : memref<16x32xbf16, #tpu.memory_space<vmem>>, vector<16x32xbf16>
      %c0_23 = arith.constant 0 : index
      %c0_24 = arith.constant 0 : index
      %33 = vector.load %arg7[%c0_23, %c0_24] : memref<32x32xbf16, #tpu.memory_space<vmem>>, vector<32x32xbf16>
      %cst_25 = arith.constant dense<0.000000e+00> : vector<16x32xf32>
      %34 = tpu.matmul %32, %33, %cst_25 {dimension_numbers = #tpu.dot_dimension_numbers<[1], [0], [0], [1], [0, 0, 1, 1], [], []>} : vector<16x32xbf16>, vector<32x32xbf16>, vector<16x32xf32> -> vector<16x32xf32>
      %c0_26 = arith.constant 0 : index
      %c0_27 = arith.constant 0 : index
      %35 = vector.load %arg5[%c0_26, %c0_27] : memref<2x32xf32, #tpu.memory_space<vmem>>, vector<1x32xf32>
      %36 = vector.shape_cast %35 : vector<1x32xf32> to vector<32xf32>
      %37 = vector.shape_cast %36 : vector<32xf32> to vector<1x32xf32>
      %38 = vector.broadcast %37 : vector<1x32xf32> to vector<16x32xf32>
      %39 = arith.addf %34, %38 : vector<16x32xf32>
      %40 = arith.addf %31, %39 : vector<16x32xf32>
      %c0_28 = arith.constant 0 : index
      %c0_29 = arith.constant 0 : index
      %41 = vector.load %arg11[%c0_28, %c0_29] : memref<16x32xf32, #tpu.memory_space<vmem>>, vector<16x32xf32>
      tpu.vector_store %arg11[%c0_28, %c0_29], %40 {strides = array<i32>} : memref<16x32xf32, #tpu.memory_space<vmem>>, vector<16x32xf32>,
      %c0_30 = arith.constant 0 : index
      %c0_31 = arith.constant 0 : index
      %42 = vector.load %arg4[%c0_30, %c0_31] : memref<2x32xf32, #tpu.memory_space<vmem>>, vector<1x32xf32>
      %43 = vector.shape_cast %42 : vector<1x32xf32> to vector<32xf32>
      %c1 = arith.constant 1 : index
      %c0_32 = arith.constant 0 : index
      %44 = vector.load %arg4[%c1, %c0_32] : memref<2x32xf32, #tpu.memory_space<vmem>>, vector<1x32xf32>
      %45 = vector.shape_cast %44 : vector<1x32xf32> to vector<32xf32>
      %cst_33 = arith.constant dense<0.000000e+00> : vector<16xf32>
      %46 = vector.multi_reduction <add>, %40, %cst_33 [1] : vector<16x32xf32> to vector<16xf32>
      %47 = vector.shape_cast %46 : vector<16xf32> to vector<16x1xf32>
      %cst_34 = arith.constant 3.200000e+01 : f32
      %48 = vector.broadcast %cst_34 : f32 to vector<16x1xf32>
      %49 = arith.divf %47, %48 : vector<16x1xf32>
      %50 = vector.broadcast %49 : vector<16x1xf32> to vector<16x32xf32>
      %51 = arith.subf %40, %50 : vector<16x32xf32>
      %52 = arith.mulf %51, %51 : vector<16x32xf32>
      %cst_35 = arith.constant dense<0.000000e+00> : vector<16xf32>
      %53 = vector.multi_reduction <add>, %52, %cst_35 [1] : vector<16x32xf32> to vector<16xf32>
      %54 = vector.shape_cast %53 : vector<16xf32> to vector<16x1xf32>
      %cst_36 = arith.constant 3.200000e+01 : f32
      %55 = vector.broadcast %cst_36 : f32 to vector<16x1xf32>
      %56 = arith.divf %54, %55 : vector<16x1xf32>
      %57 = vector.broadcast %49 : vector<16x1xf32> to vector<16x32xf32>
      %58 = arith.subf %40, %57 : vector<16x32xf32>
      %cst_37 = arith.constant 9.99999974E-6 : f32
      %59 = vector.broadcast %cst_37 : f32 to vector<16x1xf32>
      %60 = arith.addf %56, %59 : vector<16x1xf32>
      %61 = math.rsqrt %60 : vector<16x1xf32>
      %62 = vector.broadcast %61 : vector<16x1xf32> to vector<16x32xf32>
      %63 = arith.mulf %58, %62 : vector<16x32xf32>
      %64 = vector.shape_cast %43 : vector<32xf32> to vector<1x32xf32>
      %65 = vector.broadcast %64 : vector<1x32xf32> to vector<16x32xf32>
      %66 = arith.mulf %63, %65 : vector<16x32xf32>
      %67 = vector.shape_cast %45 : vector<32xf32> to vector<1x32xf32>
      %68 = vector.broadcast %67 : vector<1x32xf32> to vector<16x32xf32>
      %69 = arith.addf %66, %68 : vector<16x32xf32>
      %70 = arith.truncf %69 : vector<16x32xf32> to vector<16x32xbf16>
      %c0_38 = arith.constant 0 : index
      %c0_39 = arith.constant 0 : index
      %71 = vector.load %arg12[%c0_38, %c0_39] : memref<16x32xbf16, #tpu.memory_space<vmem>>, vector<16x32xbf16>
      tpu.vector_store %arg12[%c0_38, %c0_39], %70 {strides = array<i32>} : memref<16x32xbf16, #tpu.memory_space<vmem>>, vector<16x32xbf16>,
      %cst_40 = arith.constant 0.000000e+00 : f32
      %72 = vector.broadcast %cst_40 : f32 to vector<16x32xf32>
      %c0_41 = arith.constant 0 : index
      %c0_42 = arith.constant 0 : index
      %73 = vector.load %arg13[%c0_41, %c0_42] : memref<16x32xf32, #tpu.memory_space<vmem>>, vector<16x32xf32>
      tpu.vector_store %arg13[%c0_41, %c0_42], %72 {strides = array<i32>} : memref<16x32xf32, #tpu.memory_space<vmem>>, vector<16x32xf32>,
    } else {
    }
    %c0 = arith.constant 0 : index
    %c0_1 = arith.constant 0 : index
    %3 = vector.load %arg12[%c0, %c0_1] : memref<16x32xbf16, #tpu.memory_space<vmem>>, vector<16x32xbf16>
    %c0_2 = arith.constant 0 : index
    %c0_3 = arith.constant 0 : index
    %4 = vector.load %arg8[%c0_2, %c0_3] : memref<32x128xbf16, #tpu.memory_space<vmem>>, vector<32x128xbf16>
    %cst = arith.constant dense<0.000000e+00> : vector<16x128xf32>
    %5 = tpu.matmul %3, %4, %cst {dimension_numbers = #tpu.dot_dimension_numbers<[1], [0], [0], [1], [0, 0, 1, 1], [], []>} : vector<16x32xbf16>, vector<32x128xbf16>, vector<16x128xf32> -> vector<16x128xf32>
    %c0_4 = arith.constant 0 : index
    %c0_5 = arith.constant 0 : index
    %6 = vector.load %arg6[%c0_4, %c0_5] : memref<1x128xf32, #tpu.memory_space<vmem>>, vector<1x128xf32>
    %7 = vector.broadcast %6 : vector<1x128xf32> to vector<16x128xf32>
    %8 = arith.addf %5, %7 : vector<16x128xf32>
    %cst_6 = arith.constant 5.000000e-01 : f32
    %9 = vector.broadcast %cst_6 : f32 to vector<16x128xf32>
    %10 = arith.mulf %9, %8 : vector<16x128xf32>
    %cst_7 = arith.constant 4.471500e-02 : f32
    %11 = vector.broadcast %cst_7 : f32 to vector<16x128xf32>
    %12 = arith.mulf %11, %8 : vector<16x128xf32>
    %13 = arith.mulf %12, %8 : vector<16x128xf32>
    %14 = arith.mulf %13, %8 : vector<16x128xf32>
    %15 = arith.addf %8, %14 : vector<16x128xf32>
    %cst_8 = arith.constant 0.797884583 : f32
    %16 = vector.broadcast %cst_8 : f32 to vector<16x128xf32>
    %17 = arith.mulf %16, %15 : vector<16x128xf32>
    %18 = math.tanh %17 : vector<16x128xf32>
    %cst_9 = arith.constant 1.000000e+00 : f32
    %19 = vector.broadcast %cst_9 : f32 to vector<16x128xf32>
    %20 = arith.addf %19, %18 : vector<16x128xf32>
    %21 = arith.mulf %10, %20 : vector<16x128xf32>
    %22 = arith.truncf %21 : vector<16x128xf32> to vector<16x128xbf16>
    %c0_10 = arith.constant 0 : index
    %c0_11 = arith.constant 0 : index
    %23 = vector.load %arg13[%c0_10, %c0_11] : memref<16x32xf32, #tpu.memory_space<vmem>>, vector<16x32xf32>
    %c0_12 = arith.constant 0 : index
    %c0_13 = arith.constant 0 : index
    %24 = vector.load %arg9[%c0_12, %c0_13] : memref<128x32xbf16, #tpu.memory_space<vmem>>, vector<128x32xbf16>
    %cst_14 = arith.constant dense<0.000000e+00> : vector<16x32xf32>
    %25 = tpu.matmul %22, %24, %cst_14 {dimension_numbers = #tpu.dot_dimension_numbers<[1], [0], [0], [1], [0, 0, 1, 1], [], []>} : vector<16x128xbf16>, vector<128x32xbf16>, vector<16x32xf32> -> vector<16x32xf32>
    %26 = arith.addf %23, %25 : vector<16x32xf32>
    %c0_15 = arith.constant 0 : index
    %c0_16 = arith.constant 0 : index
    %27 = vector.load %arg13[%c0_15, %c0_16] : memref<16x32xf32, #tpu.memory_space<vmem>>, vector<16x32xf32>
    tpu.vector_store %arg13[%c0_15, %c0_16], %26 {strides = array<i32>} : memref<16x32xf32, #tpu.memory_space<vmem>>, vector<16x32xf32>,
    %c0_i32_17 = arith.constant 0 : i32
    %28 = arith.cmpi eq, %arg1, %c0_i32_17 : i32
    %29 = arith.extui %28 : i1 to i32
    %c0_i32_18 = arith.constant 0 : i32
    %30 = arith.cmpi ne, %29, %c0_i32_18 : i32
    scf.if %30 {
      %c0_19 = arith.constant 0 : index
      %c0_20 = arith.constant 0 : index
      %31 = vector.load %arg11[%c0_19, %c0_20] : memref<16x32xf32, #tpu.memory_space<vmem>>, vector<16x32xf32>
      %c0_21 = arith.constant 0 : index
      %c0_22 = arith.constant 0 : index
      %32 = vector.load %arg13[%c0_21, %c0_22] : memref<16x32xf32, #tpu.memory_space<vmem>>, vector<16x32xf32>
      %33 = arith.addf %31, %32 : vector<16x32xf32>
      %c1 = arith.constant 1 : index
      %c0_23 = arith.constant 0 : index
      %34 = vector.load %arg5[%c1, %c0_23] : memref<2x32xf32, #tpu.memory_space<vmem>>, vector<1x32xf32>
      %35 = vector.shape_cast %34 : vector<1x32xf32> to vector<32xf32>
      %36 = vector.shape_cast %35 : vector<32xf32> to vector<1x32xf32>
      %37 = vector.broadcast %36 : vector<1x32xf32> to vector<16x32xf32>
      %38 = arith.addf %33, %37 : vector<16x32xf32>
      %c0_24 = arith.constant 0 : index
      %c0_25 = arith.constant 0 : index
      %39 = vector.load %arg10[%c0_24, %c0_25] : memref<16x32xf32, #tpu.memory_space<vmem>>, vector<16x32xf32>
      tpu.vector_store %arg10[%c0_24, %c0_25], %38 {strides = array<i32>} : memref<16x32xf32, #tpu.memory_space<vmem>>, vector<16x32xf32>,
    } else {
    }
    return
  }
  func.func @transform_0(%arg0: i32, %arg1: i32) -> (i32, i32) {
    %c0_i32 = arith.constant 0 : i32
    %c0_i32_0 = arith.constant 0 : i32
    return %arg0, %c0_i32 : i32, i32
  }
  func.func @transform_1(%arg0: i32, %arg1: i32) -> (i32, i32) {
    %c0_i32 = arith.constant 0 : i32
    %c0_i32_0 = arith.constant 0 : i32
    return %arg0, %c0_i32 : i32, i32
  }
  func.func @transform_2(%arg0: i32, %arg1: i32) -> (i32, i32) {
    %c0_i32 = arith.constant 0 : i32
    %c0_i32_0 = arith.constant 0 : i32
    %c0_i32_1 = arith.constant 0 : i32
    return %c0_i32, %c0_i32_0 : i32, i32
  }
  func.func @transform_3(%arg0: i32, %arg1: i32) -> (i32, i32) {
    %c0_i32 = arith.constant 0 : i32
    %c0_i32_0 = arith.constant 0 : i32
    %c0_i32_1 = arith.constant 0 : i32
    return %c0_i32, %c0_i32_0 : i32, i32
  }
  func.func @transform_4(%arg0: i32, %arg1: i32) -> (i32, i32) {
    %c0_i32 = arith.constant 0 : i32
    %c0_i32_0 = arith.constant 0 : i32
    return %c0_i32, %arg1 : i32, i32
  }
  func.func @transform_5(%arg0: i32, %arg1: i32) -> (i32, i32) {
    %c0_i32 = arith.constant 0 : i32
    %c0_i32_0 = arith.constant 0 : i32
    %c0_i32_1 = arith.constant 0 : i32
    return %c0_i32, %c0_i32_0 : i32, i32
  }
  func.func @transform_6(%arg0: i32, %arg1: i32) -> (i32, i32) {
    %c0_i32 = arith.constant 0 : i32
    %c0_i32_0 = arith.constant 0 : i32
    return %c0_i32, %arg1 : i32, i32
  }
  func.func @transform_7(%arg0: i32, %arg1: i32) -> (i32, i32) {
    %c0_i32 = arith.constant 0 : i32
    %c0_i32_0 = arith.constant 0 : i32
    return %arg1, %c0_i32 : i32, i32
  }
  func.func @transform_8(%arg0: i32, %arg1: i32) -> (i32, i32) {
    %c0_i32 = arith.constant 0 : i32
    %c0_i32_0 = arith.constant 0 : i32
    return %arg0, %c0_i32 : i32, i32
  }
}

</mosaic_0001>

<bundles_post_ra>
// kernel: transformer_block.3
= control target key start
LH: loop header
LB: loop body
LE: loop exit
PB: predicated region body
PF: predicated region fallthrough
CT: control target
= control target key end

     0   :  { %s1400_s0 = inlined_call_operand.hbm [shape: f32[2,8,32], index: 0, kind: input, shape index: {}]   ;;  %s1401_s1 = inlined_call_operand.hbm [shape: f32[2,32], index: 1, kind: input, shape index: {}]   ;;  %s1402_s2 = inlined_call_operand.vmem [shape: f32[3,32], index: 2, kind: input, shape index: {}]   ;;  %s1403_s3 = inlined_call_operand.hbm [shape: bf16[32,32], index: 3, kind: input, shape index: {}]   ;;  %s1404_s4 = inlined_call_operand.vmem [shape: bf16[32,32], index: 4, kind: input, shape index: {}]   ;;  %s1405_s5 = inlined_call_operand.hbm [shape: bf16[32,32], index: 5, kind: input, shape index: {}]   ;;  %s1406_s6 = inlined_call_operand.vmem [shape: bf16[2,8,32], index: 6, kind: output, shape index: {0}]   ;;  %s1407_s7 = inlined_call_operand.vmem [shape: bf16[2,8,32], index: 7, kind: output, shape index: {1}]   ;;  %s1408_s8 = inlined_call_operand.vmem [shape: bf16[2,8,32], index: 8, kind: output, shape index: {2}]  }
   0x1   :  { %1413 = sst [smem:[#allocation12_spill]] %s1401_s1 }
   0x2   :  { %14 = vsyncpa [#allocation3], 0 }
   0x3   :  { %16 = vsyncpa [#allocation3 + $0x1], 0 }
   0x4   :  { %17 = vsyncpa [#allocation5], 0 }
   0x5   :  { %18 = vsyncpa [#allocation8], 0  ;;  %s1224_s27 = smov 0   ;;  %s1226_s28 = smov 0  }
   0x6   :  { %s1228_s29 = smov 0   ;;  %s1230_s30 = smov 0  }
   0x7   :  { %s1232_s9 = smov 0   ;;  %s1234_s10 = smov 0  }
   0x8 LB: > { %s841_s11 = sadd.s32 4294967295, %s1169_s10   ;;  %p58_p0 = scmp.ne.s32.totalorder %s1153_s28, %s1149_s27  ;;  %s1169_s10 = sphi %s1234_s10, %s24_s10   ;;  %s1165_s9 = sphi %s1232_s9, %s1427_s9   ;;  %s1161_s30 = sphi %s1230_s30, %s1426_s30   ;;  %s1157_s29 = sphi %s1228_s29, %s1425_s29   ;;  %s1153_s28 = sphi %s1226_s28, %s1424_s28   ;;  %s1149_s27 = sphi %s1224_s27, %s1423_s27  }
   0x9   : > { %p1254_p1 = scmp.eq.s32.totalorder %s841_s11, 0  ;;  %p843_p2 = scmp.ge.s32.totalorder %s1169_s10, 1 }
   0xa   : > { %p258_p3 = scmp.lt.s32.totalorder %s1169_s10, 3  ;;  %s1171_s15 = smov [#allocation4]  }
   0xb   : > { %s1414_s12 = scalar_select %p1254_p1, 1, 0 }
   0xc   : > { %p1262_p4 = por %p1254_p1, %p58_p0  ;;  %p1266_p5 = pnand %p843_p2, %p258_p3 }
   0xd   : > { %s271_s16 = sshll.u32 %s1171_s15, 4  ;;  %s1172_s17 = smov [#allocation6]   ;;  %s272_s16 = int_to_ptr.vmem [resolvable:$true] %s271_s16 }
   0xe   : > { %s1415_s13 = scalar_select %p1262_p4, 1, 0 }
   0xf   : > { %s1416_s14 = scalar_select %p1266_p5, 1, 0 }
  0x10   : > { %p921_p6 = pneg %p1266_p5  ;;  %s284_s18 = sshll.u32 %s1172_s17, 4  ;;  %s285_s18 = int_to_ptr.vmem [resolvable:$true] %s284_s18 }
  0x11   : > { %s1173_s20 = smov [#allocation7]   ;;  %s1016_s22 = scalar_lea.vmem %s272_s16, 32 }
  0x12   : > { %p1274_p7 = pnand %p921_p6, %p1254_p1  ;;  %s300_s21 = sshll.u32 %s1173_s20, 4  ;;  %s301_s21 = int_to_ptr.vmem [resolvable:$true] %s300_s21 }
  0x13   : > { %p1017_p9 = scmp.ne.s32.totalorder %s272_s16, %s1016_s22  ;;  %p1024_p12 = scmp.lt.s32.totalorder %s272_s16, %s272_s16 }
  0x14   : > { %p1007_p8 = pneg %p1274_p7  ;;  %p1025_p13 = scmp.lt.s32.totalorder %s1016_s22, %s1016_s22 }
  0x16   : > { %p1019_p10 = pnand %p1017_p9, %p1007_p8  ;;  %p1026_p0 = por %p1025_p13, %p1024_p12 }
  0x18   : > { %p1020_p11 = pneg %p1019_p10 }
  0x1a   : > { %p1027_p2 = pnand %p1026_p0, %p1020_p11 }
  0x1c   : > { %1030 = shalt.err (!%p1027_p2)
}
  0x1d   : > { %s1418_s1 = sld [smem:[#allocation12_spill]]  ;;  %s1042_s25 = scalar_lea.vmem %s285_s18, 256 }
  0x1e   : > { %p1043_p3 = scmp.ne.s32.totalorder %s285_s18, %s1042_s25  ;;  %p1050_p9 = scmp.lt.s32.totalorder %s285_s18, %s285_s18 }
  0x1f   : > { %p1051_p10 = scmp.lt.s32.totalorder %s1042_s25, %s1042_s25 }
  0x20   : > { %p1045_p6 = pnand %p1043_p3, %p1007_p8 }
  0x21   : > { %p1052_p4 = por %p1051_p10, %p1050_p9 }
  0x22   : > { %p1046_p1 = pneg %p1045_p6 }
  0x23   : > { %924 = dma.hbm_to_vmem [thread:$0]  (!%p1274_p7), %s1418_s1, 32, %s272_s16, [#allocation5]  }
  0x24   : > { %p1053_p5 = pnand %p1052_p4, %p1046_p1 }
  0x26   : > { %1056 = shalt.err (!%p1053_p5)
}
  0x27   : > { %s1174_s26 = smov 64   ;;  %s1175_s27 = smov 4  }
  0x28   : > { %927 = dma.hbm_to_vmem [thread:$0]  (!%p1274_p7), %s1403_s3, 256, %s285_s18, [#allocation5], %s1174_s26, %s1174_s26, %s1175_s27  }
  0x29   : > { %s1068_s16 = scalar_lea.vmem %s301_s21, 256  ;;  %p1076_p0 = scmp.lt.s32.totalorder %s301_s21, %s301_s21 }
  0x2a   : > { %p1069_p11 = scmp.ne.s32.totalorder %s301_s21, %s1068_s16  ;;  %p1077_p2 = scmp.lt.s32.totalorder %s1068_s16, %s1068_s16 }
  0x2c   : > { %p1071_p12 = pnand %p1069_p11, %p1007_p8  ;;  %p1078_p1 = por %p1077_p2, %p1076_p0 }
  0x2e   : > { %p1072_p13 = pneg %p1071_p12 }
  0x30   : > { %p1079_p4 = pnand %p1078_p1, %p1072_p13 }
  0x32   : > { %1082 = shalt.err (!%p1079_p4)
}
  0x33   : > { %930 = dma.hbm_to_vmem [thread:$0]  (!%p1274_p7), %s1405_s5, 256, %s301_s21, [#allocation8], %s1174_s26, %s1174_s26, %s1175_s27  }
  0x34   : > { %s36_s18 = sadd.s32 1, %s1165_s9  ;;  %p52_p5 = scmp.ne.s32.totalorder %s1157_s29, %s1153_s28 }
  0x35   : > { %p38_p8 = scmp.ge.s32.totalorder %s36_s18, 2  ;;  %p53_p3 = scmp.eq.s32.totalorder %s1169_s10, 0 }
  0x36   : > { %s45_s22 = sadd.s32 1, %s1157_s29  ;;  %s314_s19 = sand.u32 1, %s1157_s29  }
  0x37   : > { %s1429_s18 = smov (%p38_p8, %s36_s18), 0  ;;  %p54_p6 = por %p53_p3, %p52_p5 }
  0x38   : > { %p938_p9 = scmp.lt.s32.totalorder %s1169_s10, 2  ;;  %s40_s23 = ssub.s32 %s1165_s9, %s1429_s18 }
  0x39   : > { %s848_s24 = sshll.u32 %s314_s19, 3  ;;  %p43_p10 = scmp.eq.s32.totalorder %s40_s23, 0 }
  0x3a   : > { %s849_s25 = sshll.u32 %s1165_s9, 7  ;;  %s318_s11 = scalar_lea.vmem [#allocation2], %s848_s24 }
  0x3b   : > { %s326_s15 = sshll.u32 %s318_s11, 4  ;;  %s324_s27 = scalar_lea.hbm %s1400_s0, %s849_s25  ;;  %s327_s15 = int_to_ptr.vmem [resolvable:$true] %s326_s15 }
  0x3c   : > { %s1317_s16 = scalar_select %p43_p10, %s1157_s29, %s45_s22  }
  0x3d   : > { %p1322_p7 = pnand %p938_p9, %p54_p6  ;;  %s315_s20 = scalar_lea.sflag [#allocation3], %s314_s19 }
  0x3e   : > { %s1096_s1 = scalar_lea.vmem %s327_s15, 128  ;;  %s1176_s23 = smov [#allocation2]  }
  0x3f   : > { %p1085_p11 = pneg %p1322_p7  ;;  %p1097_p12 = scmp.ne.s32.totalorder %s327_s15, %s1096_s1 }
  0x40   : > { %s1101_s22 = sshll.u32 %s1176_s23, 4  ;;  %s1102_s22 = int_to_ptr.vmem [resolvable:$false] %s1101_s22 }
  0x41   : > { %p1099_p13 = pnand %p1097_p12, %p1085_p11  ;;  %s1103_s24 = scalar_lea.vmem %s1102_s22, 256 }
  0x42   : > { %p1104_p2 = scmp.lt.s32.totalorder %s327_s15, %s1102_s22  ;;  %p1105_p1 = scmp.lt.s32.totalorder %s1103_s24, %s1096_s1 }
  0x43   : > { %p1100_p0 = pneg %p1099_p13 }
  0x44   : > { %p1106_p4 = por %p1105_p1, %p1104_p2 }
  0x46   : > { %p1107_p5 = pnand %p1106_p4, %p1100_p0 }
  0x48   : > { %1110 = shalt.err (!%p1107_p5)
}
  0x49   : > { %934 = dma.hbm_to_vmem [thread:$0]  (!%p1322_p7), %s324_s27, 128, %s327_s15, %s315_s20  }
  0x4a   : > { %p1420_p8 = scmp.ne.s32.totalorder %s1416_s14, 0 }
  0x4b   : > { %s337_s19 = sand.u32 (!%p1420_p8), 1, %s1153_s28   ;;  %p1421_p3 = scmp.ne.s32.totalorder (!%p1420_p8), %s1415_s13, 0 }
  0x4c   : > { %335 = sbr.rel (%p1420_p8) target bundleno = 605 (0x25d), region = 44  ;;  %s851_s25 = sshll.u32 (!%p1420_p8), %s337_s19, 3 }
  0x4d   : > { %s338_s11 = scalar_lea.sflag (!%p1420_p8), [#allocation3], %s337_s19  ;;  %s341_s21 = scalar_lea.vmem (!%p1420_p8), [#allocation2], %s851_s25 }
  0x51   : > { %1136 = dma.done.wait (%p1421_p3), %s338_s11, 128  }
  0x52   : > { %1138 = vsyncadd (%p1421_p3), %s338_s11, 4294967168  ;;  %p1422_p6 = scmp.ne.s32.totalorder %s1414_s12, 0 }
  0x54   : > { %1140 = dma.done.wait (%p1422_p6), [#allocation5], 288  }
  0x55   : > { %1142 = vsyncadd (%p1422_p6), [#allocation5], 4294967008 }
  0x56   : > { %1144 = dma.done.wait (%p1422_p6), [#allocation8], 256  }
  0x57   : > { %1146 = vsyncadd (%p1422_p6), [#allocation8], 4294967040  ;;  %vm427_vm0 = vcmask 261120   ;;  %v424_v0 = vld [vmem:[%s341_s21] sm:$0xff]  ;;  %v1177_v9 = vmov 0.0   ;;  %v999_v10 = vld [vmem:[#allocation6] sm:$0xff]  }
  0x58   : > { %v428_v1 = vsel %vm427_vm0, %v424_v0, 0.0  ;;  %v997_v7 = vld [vmem:[#allocation6 + $0x8] sm:$0xff]   ;;  %v998_v8 = vld [vmem:[%s1404_s4 + $0x8] sm:$0xff]   ;;  %883 = vmatprep.subr.bf16.mxu0 %v1177_v9  ;;  %891 = vmatprep.subr.bf16.mxu1 %v1177_v9  ;;  %vm1178_vm1 = vmmov 0   ;;  %v858_v16 = vld [vmem:[#allocation4] ss:$0 sm:$0xff] }
  0x59   : > { %429 = vadd.xlane.f32.xlu0 %v428_v1  ;;  %884 = vmatpush3.bf16.msra.mxu0 %v997_v7  ;;  %v1000_v11 = vld [vmem:[%s1404_s4] sm:$0xff]   ;;  %v859_v18 = vld [vmem:[#allocation4 + $0x1] ss:$0 sm:$0xff]  ;;  %p402_p9 = scmp.lt.s32.totalorder %s1161_s30, 1  ;;  %vm518_vm2 = vcmask 257024  }
  0x5a   : > { %892 = vmatpush3.bf16.msra.mxu1 %v998_v8  ;;  %885 = vmatprep.subr.bf16.mxu0 %v1177_v9  ;;  %v1001_v21 = vld [vmem:[#allocation7 + $0x8] sm:$0xff]   ;;  %v1002_v23 = vld [vmem:[#allocation7] sm:$0xff]   ;;  %v860_v24 = vld [vmem:[%s1402_s2] ss:$0 sm:$0xff] }
  0x5b   : > { %893 = vmatprep.subr.bf16.mxu1 %v1177_v9  ;;  %887 = vmatprep.mubr.msk.bf16.mxu0 %vm1178_vm1, %v1177_v9  ;;  %s1431_s30 = smov (!%p402_p9, %s1161_s30), 1  ;;  %v864_v25 = vld [vmem:[%s1402_s2 + $0x1] ss:$0 sm:$0xff]  ;;  %v868_v38 = vld [vmem:[%s1402_s2 + $0x2] ss:$0 sm:$0xff] }
  0x5c   : > { %895 = vmatprep.mubr.msk.bf16.mxu1 %vm1178_vm1, %v1177_v9  ;;  %s855_s20 = sshll.u32 %s1431_s30, 2 }
  0x5d   : > { %886 = vmatpush3.bf16.msra.mxu0 %v999_v10  ;;  %s408_s24 = scalar_lea.vmem %s1406_s6, %s855_s20  ;;  %s415_s11 = scalar_lea.vmem %s1407_s7, %s855_s20 }
  0x5e   : > { %894 = vmatpush3.bf16.msra.mxu1 %v1000_v11  ;;  %899 = vmatprep.subr.bf16.mxu0 %v1177_v9  ;;  %s422_s12 = scalar_lea.vmem %s1408_s8, %s855_s20 }
  0xe2   : > { %v430_v2 = vpop.xlane.xlu0 %429 }
  0xe3   : > { %v432_v3 = vmul.f32 0.03125, %v430_v2 }
  0xe5   : > { %v433_v4 = vsub.f32 %v424_v0, %v432_v3 }
  0xe7   : > { %v434_v5 = vmul.f32 %v433_v4, %v433_v4 }
  0xe9   : > { %v435_v6 = vsel %vm427_vm0, %v434_v5, 0.0 }
  0xea   : > { %436 = vadd.xlane.f32.xlu0 %v435_v6 }
 0x173   : > { %v437_v12 = vpop.xlane.xlu0 %436 }
 0x174   : > { %v438_v13 = vmul.f32 0.03125, %v437_v12 }
 0x176   : > { %v439_v14 = vadd.f32 1e-05, %v438_v13 }
 0x178   : > { %1003 = vrsqrt.f32 %v439_v14 }
 0x185   : > { %v1004_v15 = vpop.eup %1003 }
 0x186   : > { %v441_v17 = vmul.f32 %v1004_v15, %v433_v4 }
 0x188   : > { %v446_v19 = vmul.f32 %v858_v16, %v441_v17 }
 0x18a   : > { %v451_v20 = vadd.f32 %v859_v18, %v446_v19 }
 0x18c   : > { %v452_v22 = vpack.c.bf16 %v451_v20, %v451_v20 }
 0x18e   : > { %888 = vmatmul.mubr.msk.bf16.vlgmr.msra.gmra.mxu0 %vm427_vm0, %v452_v22  ;;  %896 = vmatmul.mubr.msk.bf16.vlgmr.msra.gmra.mxu1 %vm427_vm0, %v452_v22 }
 0x18f   : > { %900 = vmatpush3.bf16.msra.mxu0 %v1001_v21  ;;  %903 = vmatprep.mubr.msk.bf16.mxu0 %vm1178_vm1, %v1177_v9 }
 0x190   : > { %901 = vmatprep.subr.bf16.mxu0 %v1177_v9 }
 0x193   : > { %902 = vmatpush3.bf16.msra.mxu0 %v1002_v23 }
 0x196   : > { %904 = vmatmul.mubr.msk.bf16.vlgmr.msra.gmra.mxu0 %vm427_vm0, %v452_v22 }
 0x24e   : > { %v511_v26 = vpop.f32.mrf.mxu0  ;;  %v575_v27 = vpop.f32.mrf.mxu1 }
 0x24f   : > { %v512_v28 = vadd.f32 %v860_v24, %v511_v26  ;;  %v576_v29 = vadd.f32 %v864_v25, %v575_v27 }
 0x250   : > { %v889_v30 = vpop.f32.mrf.mxu0  ;;  %v897_v31 = vpop.f32.mrf.mxu1 }
 0x251   : > { %v517_v32 = vpack.c.bf16 %v512_v28, %v512_v28  ;;  %v581_v33 = vpack.c.bf16 %v576_v29, %v576_v29 }
 0x252   : > { %v514_v34 = vpop.f32.mrf.mxu0  ;;  %v578_v35 = vpop.f32.mrf.mxu1 }
 0x253   : > { %519 = vst.msk [vmem:[%s408_s24] sm:$0xf] %vm518_vm2, %v517_v32  ;;  %582 = vst.msk [vmem:[%s415_s11] sm:$0xf] %vm518_vm2, %v581_v33 }
 0x254   : > { %v890_v36 = vpop.f32.mrf.mxu0  ;;  %v898_v37 = vpop.f32.mrf.mxu1 }
 0x256   : > { %v638_v39 = vpop.f32.mrf.mxu0 }
 0x257   : > { %v639_v40 = vadd.f32 %v868_v38, %v638_v39 }
 0x258   : > { %v905_v41 = vpop.f32.mrf.mxu0 }
 0x259   : > { %v644_v42 = vpack.c.bf16 %v639_v40, %v639_v40 }
 0x25a   : > { %v641_v43 = vpop.f32.mrf.mxu0 }
 0x25b   : > { %645 = vst.msk [vmem:[%s422_s12] sm:$0xf] %vm518_vm2, %v644_v42 }
 0x25c   : > { %v906_v44 = vpop.f32.mrf.mxu0 }
 0x25d PF: > { %s24_s10 = sadd.s32 1, %s1169_s10   ;;  %s1423_s27 = smov %s1153_s28 }
 0x25e   : > { %p21_p10 = scmp.ge.s32.totalorder %s24_s10, 4   ;;  %s1424_s28 = smov %s1157_s29 }
 0x25f   : > { %s1425_s29 = smov %s1317_s16  ;;  %s1426_s30 = smov %s1165_s9 }
 0x260   : > { %s1427_s9 = smov %s1429_s18  ;;  %23 = sbr.rel (!%p21_p10) target bundleno = 8 (0x8), region = 120 }
 0x265   :  { %711 = vsyncpa [#allocation3], 1 }
 0x266   :  { %713 = vsyncpa [#allocation3 + $0x1], 1 }
 0x267   :  { %714 = vsyncpa [#allocation5], 1 }
 0x268   :  { %715 = vsyncpa [#allocation8], 1 }

// kernel: transformer_block.4
= control target key start
LH: loop header
LB: loop body
LE: loop exit
PB: predicated region body
PF: predicated region fallthrough
CT: control target
= control target key end

     0   :  { %s1221_s12 = smov 0   ;;  %s1223_s13 = smov 0   ;;  %s1408_s0 = inlined_call_operand.vmem [shape: bf16[2,4,8,8], index: 0, kind: input, shape index: {}]   ;;  %s1409_s1 = inlined_call_operand.vmem [shape: bf16[2,4,8,8], index: 1, kind: input, shape index: {}]   ;;  %s1410_s2 = inlined_call_operand.vmem [shape: bf16[2,4,8,8], index: 2, kind: input, shape index: {}]   ;;  %s1411_s3 = inlined_call_operand.vmem [shape: bf16[2,4,8,8], index: 3, kind: output, shape index: {}]  }
   0x1   :  { %s1225_s14 = smov 0  }
   0x2 LB: > { %s32_s15 = sadd.s32 1, %s1191_s13  ;;  %p1032_p0 = scmp.ge.s32.totalorder %s1195_s14, 1  ;;  %s1195_s14 = sphi %s1225_s14, %s13_s14   ;;  %s1191_s13 = sphi %s1223_s13, %s1413_s13   ;;  %s1187_s12 = sphi %s1221_s12, %s1412_s12  }
   0x3   : > { %p34_p1 = scmp.ge.s32.totalorder %s32_s15, 2  ;;  %p209_p2 = scmp.lt.s32.totalorder %s1195_s14, 3 }
   0x5   : > { %s1415_s15 = smov (%p34_p1, %s32_s15), 0  ;;  %p210_p3 = pnand %p1032_p0, %p209_p2 }
   0x6   : > { %p259_p4 = scmp.lt.s32.totalorder (!%p210_p3), %s1187_s12, 1 }
   0x7   : > { %213 = sbr.rel (%p210_p3) target bundleno = 805 (0x325), region = 32 }
   0xc   : > { %vm313_vm0 = vcmask 64512   ;;  %v1197_v0 = vmov 0.0   ;;  %s1417_s12 = smov (!%p259_p4, %s1187_s12), 1  ;;  %vm1198_vm1 = vmmov 0   ;;  %vm304_vm2 = vcmask 7168  }
   0xd   : > { %1071 = vmatprep.subr.bf16.mxu0 %v1197_v0  ;;  %1077 = vmatprep.subr.bf16.mxu1 %v1197_v0  ;;  %314 = vst.msk [vmem:[#allocation4] sm:$0xff] %vm313_vm0, %v1197_v0  ;;  %315 = vst.msk [vmem:[#allocation4 + $0x8] sm:$0xff] %vm313_vm0, %v1197_v0  ;;  %s1253_s16 = sshll.u32 %s1417_s12, 4  ;;  %v1199_v13 = vmov -inf   ;;  %v520_v14 = vlaneseq  ;;  %v1200_v41 = vmov 0   ;;  %vm664_vm4 = vcmask 1043456  }
   0xe   : > { %316 = vst.msk [vmem:[#allocation4 + $0x10] sm:$0xff] %vm313_vm0, %v1197_v0  ;;  %317 = vst.msk [vmem:[#allocation4 + $0x18] sm:$0xff] %vm313_vm0, %v1197_v0  ;;  %1073 = vmatprep.mubr.msk.bf16.mxu0 %vm1198_vm1, %v1197_v0  ;;  %1079 = vmatprep.mubr.msk.bf16.mxu1 %vm1198_vm1, %v1197_v0  ;;  %s276_s19 = scalar_lea.vmem %s1409_s1, %s1253_s16  ;;  %s266_s22 = scalar_lea.vmem %s1408_s0, %s1253_s16  ;;  %vm901_vm5 = vcmask 60416  }
   0xf   : > { %v326_v1 = vld [vmem:[%s276_s19] sm:$0xf]  ;;  %v327_v2 = vld [vmem:[%s276_s19 + $0x4] sm:$0xf]  ;;  %v328_v5 = vld [vmem:[%s276_s19 + $0x8] sm:$0xf]  ;;  %1147 = vset.pattern.permute.xlu0 %v1200_v41  ;;  %1148 = vset.pattern.permute.xlu1 %v1200_v41  ;;  %s288_s25 = scalar_lea.vmem %s1410_s2, %s1253_s16  ;;  %s298_s28 = scalar_lea.vmem %s1411_s3, %s1253_s16 }
  0x10   : > { %v339_v3 = vsel %vm313_vm0, %v326_v1, 0  ;;  %v385_v4 = vsel %vm313_vm0, %v327_v2, 0  ;;  %v329_v6 = vld [vmem:[%s276_s19 + $0xc] sm:$0xf]  ;;  %v322_v7 = vld [vmem:[%s266_s22] sm:$0xf] }
  0x11   : > { %1072 = vmatpush3.bf16.xpose.msra.mxu0 %v339_v3  ;;  %1078 = vmatpush3.bf16.xpose.msra.mxu1 %v385_v4  ;;  %v323_v8 = vld [vmem:[%s266_s22 + $0x4] sm:$0xf]  ;;  %v431_v9 = vsel %vm313_vm0, %v328_v5, 0  ;;  %v477_v10 = vsel %vm313_vm0, %v329_v6, 0  ;;  %v324_v11 = vld [vmem:[%s266_s22 + $0x8] sm:$0xf] }
  0x12   : > { %1083 = vmatprep.subr.bf16.mxu0 %v1197_v0  ;;  %1089 = vmatprep.subr.bf16.mxu1 %v1197_v0  ;;  %v325_v12 = vld [vmem:[%s266_s22 + $0xc] sm:$0xf]  ;;  %305 = vst.msk [vmem:[#allocation2] sm:$0xff] %vm304_vm2, %v1199_v13  ;;  %306 = vst.msk [vmem:[#allocation2 + $0x8] sm:$0xff] %vm304_vm2, %v1199_v13  ;;  %v521_v15 = vshrl.u32 %v520_v14, 7  ;;  %v526_v16 = vand.u32 127, %v520_v14 }
  0x13   : > { %307 = vst.msk [vmem:[#allocation2 + $0x10] sm:$0xff] %vm304_vm2, %v1199_v13  ;;  %308 = vst.msk [vmem:[#allocation2 + $0x18] sm:$0xff] %vm304_vm2, %v1199_v13  ;;  %v330_v57 = vld [vmem:[%s288_s25] sm:$0xf]  ;;  %v331_v60 = vld [vmem:[%s288_s25 + $0x4] sm:$0xf] }
  0x14   : > { %309 = vst.msk [vmem:[#allocation3] sm:$0xff] %vm304_vm2, %v1197_v0  ;;  %310 = vst.msk [vmem:[#allocation3 + $0x8] sm:$0xff] %vm304_vm2, %v1197_v0  ;;  %vm529_vm3 = vcmp.le.s32.totalorder %v526_v16, %v521_v15  ;;  %v666_v59 = vsel %vm664_vm4, %v330_v57, 0  ;;  %v712_v61 = vsel %vm664_vm4, %v331_v60, 0  ;;  %v332_v62 = vld [vmem:[%s288_s25 + $0x8] sm:$0xf] }
  0x15   : > { %311 = vst.msk [vmem:[#allocation3 + $0x10] sm:$0xff] %vm304_vm2, %v1197_v0  ;;  %312 = vst.msk [vmem:[#allocation3 + $0x18] sm:$0xff] %vm304_vm2, %v1197_v0  ;;  %v758_v63 = vsel %vm664_vm4, %v332_v62, 0  ;;  %v333_v1 = vld [vmem:[%s288_s25 + $0xc] sm:$0xf] }
  0x16   : > { %v804_v2 = vsel %vm664_vm4, %v333_v1, 0 }
  0x18   : > { %1074 = vmatmul.mubr.msk.bf16.vlgmr.msra.gmra.mxu0 %vm313_vm0, %v322_v7  ;;  %1080 = vmatmul.mubr.msk.bf16.vlgmr.msra.gmra.mxu1 %vm313_vm0, %v323_v8 }
  0x19   : > { %1084 = vmatpush3.bf16.xpose.msra.mxu0 %v431_v9  ;;  %1090 = vmatpush3.bf16.xpose.msra.mxu1 %v477_v10  ;;  %v1315_v42 = vld [vmem:[#allocation2] sm:$0xff]  ;;  %v1320_v45 = vld [vmem:[#allocation2 + $0x8] sm:$0xff] }
  0x1a   : > { %1085 = vmatprep.mubr.msk.bf16.mxu0 %vm1198_vm1, %v1197_v0  ;;  %1091 = vmatprep.mubr.msk.bf16.mxu1 %vm1198_vm1, %v1197_v0  ;;  %v1330_v49 = vld [vmem:[#allocation2 + $0x10] sm:$0xff]  ;;  %v1340_v53 = vld [vmem:[#allocation2 + $0x18] sm:$0xff] }
  0x1b   : > { %1095 = vmatprep.subr.bf16.mxu0 %v1197_v0  ;;  %1101 = vmatprep.subr.bf16.mxu1 %v1197_v0 }
  0x1c   : > { %v602_v41 = vld [vmem:[#allocation3 + $0x10] sm:$0xff] }
  0x20   : > { %1086 = vmatmul.mubr.msk.bf16.vlgmr.msra.gmra.mxu0 %vm313_vm0, %v324_v11  ;;  %1092 = vmatmul.mubr.msk.bf16.vlgmr.msra.gmra.mxu1 %vm313_vm0, %v325_v12 }
  0x21   : > { %1097 = vmatprep.mubr.msk.bf16.mxu0 %vm1198_vm1, %v1197_v0  ;;  %1103 = vmatprep.mubr.msk.bf16.mxu1 %vm1198_vm1, %v1197_v0 }
  0x22   : > { %1096 = vmatpush3.bf16.msra.mxu0 %v666_v59  ;;  %1102 = vmatpush3.bf16.msra.mxu1 %v712_v61  ;;  %v629_v59 = vld [vmem:[#allocation4] sm:$0xff]  ;;  %v630_v61 = vld [vmem:[#allocation4 + $0x8] sm:$0xff] }
  0x23   : > { %1107 = vmatprep.subr.bf16.mxu0 %v1197_v0  ;;  %1113 = vmatprep.subr.bf16.mxu1 %v1197_v0 }
  0xd8   : > { %v375_v17 = vpop.f32.mrf.mxu0  ;;  %v421_v18 = vpop.f32.mrf.mxu1 }
  0xd9   : > { %v1296_v19 = vsel %vm529_vm3, %v375_v17, -1e+30  ;;  %v1299_v20 = vsel %vm529_vm3, %v421_v18, -1e+30 }
  0xda   : > { %v1075_v21 = vpop.f32.mrf.mxu0  ;;  %v1081_v22 = vpop.f32.mrf.mxu1  ;;  %v540_v23 = vsel %vm313_vm0, %v1296_v19, -inf  ;;  %v543_v26 = vsel %vm313_vm0, %v1299_v20, -inf }
  0xdb   : > { %541 = vmax.xlane.f32.xlu0 %v540_v23 }
  0xdc   : > { %v378_v24 = vpop.f32.mrf.mxu0  ;;  %v424_v25 = vpop.f32.mrf.mxu1 }
  0xde   : > { %v1076_v27 = vpop.f32.mrf.mxu0  ;;  %v1082_v28 = vpop.f32.mrf.mxu1 }
  0xdf   : > { %544 = vmax.xlane.f32.xlu0 %v543_v26 }
  0xe0   : > { %v467_v29 = vpop.f32.mrf.mxu0  ;;  %v513_v30 = vpop.f32.mrf.mxu1 }
  0xe1   : > { %v1306_v31 = vsel %vm529_vm3, %v467_v29, -1e+30  ;;  %v1309_v32 = vsel %vm529_vm3, %v513_v30, -1e+30 }
  0xe2   : > { %v1087_v33 = vpop.f32.mrf.mxu0  ;;  %v1093_v34 = vpop.f32.mrf.mxu1  ;;  %v546_v35 = vsel %vm313_vm0, %v1306_v31, -inf  ;;  %v549_v38 = vsel %vm313_vm0, %v1309_v32, -inf }
  0xe3   : > { %547 = vmax.xlane.f32.xlu1 %v546_v35  ;;  %v600_v34 = vld [vmem:[#allocation3] sm:$0xff] }
  0xe4   : > { %v470_v36 = vpop.f32.mrf.mxu0  ;;  %v516_v37 = vpop.f32.mrf.mxu1 }
  0xe5   : > { %v601_v37 = vld [vmem:[#allocation3 + $0x8] sm:$0xff] }
  0xe6   : > { %v1088_v39 = vpop.f32.mrf.mxu0  ;;  %v1094_v40 = vpop.f32.mrf.mxu1 }
  0xe7   : > { %550 = vmax.xlane.f32.xlu1 %v549_v38 }
 0x164   : > { %v542_v43 = vpop.xlane.xlu0 %541 }
 0x165   : > { %v1318_v44 = vmax.f32 %v1315_v42, %v542_v43 }
 0x167   : > { %v556_v46 = vsub.f32 %v1315_v42, %v1318_v44  ;;  %854 = vst.msk [vmem:[#allocation2] sm:$0xff] %vm304_vm2, %v1318_v44  ;;  %570 = vperm.xlu0 %1147, %v1318_v44  }
 0x168   : > { %v545_v47 = vpop.xlane.xlu0 %544 }
 0x169   : > { %v1328_v48 = vmax.f32 %v1320_v45, %v545_v47  ;;  %v560_v26 = vmul.f32 1.442695, %v556_v46 }
 0x16b   : > { %v557_v50 = vsub.f32 %v1320_v45, %v1328_v48  ;;  %855 = vst.msk [vmem:[#allocation2 + $0x8] sm:$0xff] %vm304_vm2, %v1328_v48  ;;  %575 = vperm.xlu1 %1148, %v1328_v48   ;;  %v603_v45 = vld [vmem:[#allocation3 + $0x18] sm:$0xff] }
 0x16c   : > { %v548_v51 = vpop.xlane.xlu1 %547 }
 0x16d   : > { %v1338_v52 = vmax.f32 %v1330_v49, %v548_v51  ;;  %v562_v24 = vmul.f32 1.442695, %v557_v50 }
 0x16f   : > { %v558_v54 = vsub.f32 %v1330_v49, %v1338_v52  ;;  %856 = vst.msk [vmem:[#allocation2 + $0x10] sm:$0xff] %vm304_vm2, %v1338_v52  ;;  %580 = vperm.xlu1 %1148, %v1338_v52  }
 0x170   : > { %v551_v55 = vpop.xlane.xlu1 %550 }
 0x171   : > { %v1348_v56 = vmax.f32 %v1340_v53, %v551_v55 }
 0x173   : > { %v559_v58 = vsub.f32 %v1340_v53, %v1348_v56  ;;  %857 = vst.msk [vmem:[#allocation2 + $0x18] sm:$0xff] %vm304_vm2, %v1348_v56  ;;  %585 = vperm.xlu1 %1148, %v1348_v56  }
 0x175   : > { %v566_v29 = vmul.f32 1.442695, %v559_v58 }
 0x1e2   : > { %v571_v3 = vpop.permute.xlu0 %570 }
 0x1e3   : > { %v588_v4 = vsub.f32 %v1296_v19, %v571_v3 }
 0x1e5   : > { %v592_v5 = vmul.f32 1.442695, %v588_v4 }
 0x1e6   : > { %v576_v6 = vpop.permute.xlu1 %575 }
 0x1e7   : > { %1149 = vpow2.f32 %v592_v5  ;;  %v589_v7 = vsub.f32 %v1299_v20, %v576_v6  ;;  %v631_v5 = vld [vmem:[#allocation4 + $0x10] sm:$0xff] }
 0x1e9   : > { %v594_v8 = vmul.f32 1.442695, %v589_v7 }
 0x1ea   : > { %v581_v9 = vpop.permute.xlu1 %580 }
 0x1eb   : > { %1151 = vpow2.f32 %v594_v8  ;;  %v590_v10 = vsub.f32 %v1306_v31, %v581_v9 }
 0x1ed   : > { %v596_v11 = vmul.f32 1.442695, %v590_v10 }
 0x1ee   : > { %v586_v12 = vpop.permute.xlu1 %585 }
 0x1ef   : > { %1153 = vpow2.f32 %v596_v11  ;;  %v591_v13 = vsub.f32 %v1309_v32, %v586_v12 }
 0x1f1   : > { %v598_v14 = vmul.f32 1.442695, %v591_v13  ;;  %v632_v13 = vld [vmem:[#allocation4 + $0x18] sm:$0xff] }
 0x1f3   : > { %1155 = vpow2.f32 %v598_v14 }
 0x1f4   : > { %v1150_v15 = vpop.eup %1149  ;;  %1157 = vpow2.f32 %v562_v24 }
 0x1f5   : > { %v608_v16 = vsel %vm313_vm0, %v1150_v15, 0.0  ;;  %v657_v17 = vpack.c.bf16 %v1150_v15, %v1150_v15  ;;  %1159 = vpow2.f32 %v560_v26 }
 0x1f6   : > { %609 = vadd.xlane.f32.xlu1 %v608_v16 }
 0x1f7   : > { %1098 = vmatmul.mubr.msk.bf16.vlgmr.msra.gmra.mxu0 %vm313_vm0, %v657_v17 }
 0x1f8   : > { %v1152_v18 = vpop.eup %1151  ;;  %1108 = vmatpush3.bf16.msra.mxu0 %v758_v63  ;;  %1109 = vmatprep.mubr.msk.bf16.mxu0 %vm1198_vm1, %v1197_v0 }
 0x1f9   : > { %v611_v19 = vsel %vm313_vm0, %v1152_v18, 0.0  ;;  %v658_v20 = vpack.c.bf16 %v1152_v18, %v1152_v18 }
 0x1fa   : > { %612 = vadd.xlane.f32.xlu0 %v611_v19 }
 0x1fb   : > { %1104 = vmatmul.mubr.msk.bf16.vlgmr.msra.gmra.mxu1 %vm313_vm0, %v658_v20 }
 0x1fc   : > { %v1154_v21 = vpop.eup %1153  ;;  %1114 = vmatpush3.bf16.msra.mxu1 %v804_v2  ;;  %1115 = vmatprep.mubr.msk.bf16.mxu1 %vm1198_vm1, %v1197_v0  ;;  %v564_v0 = vmul.f32 1.442695, %v558_v54 }
 0x1fd   : > { %v614_v22 = vsel %vm313_vm0, %v1154_v21, 0.0  ;;  %v659_v23 = vpack.c.bf16 %v1154_v21, %v1154_v21 }
 0x1fe   : > { %615 = vadd.xlane.f32.xlu1 %v614_v22  ;;  %1161 = vpow2.f32 %v564_v0 }
 0x1ff   : > { %1110 = vmatmul.mubr.msk.bf16.vlgmr.msra.gmra.mxu0 %vm313_vm0, %v659_v23  ;;  %1163 = vpow2.f32 %v566_v29 }
 0x200   : > { %v1156_v25 = vpop.eup %1155 }
 0x201   : > { %v617_v27 = vsel %vm313_vm0, %v1156_v25, 0.0  ;;  %v660_v28 = vpack.c.bf16 %v1156_v25, %v1156_v25  ;;  %v1158_v30 = vpop.eup %1157 }
 0x202   : > { %618 = vadd.xlane.f32.xlu1 %v617_v27  ;;  %v1160_v31 = vpop.eup %1159  ;;  %v605_v39 = vmul.f32 %v1158_v30, %v601_v37 }
 0x203   : > { %1116 = vmatmul.mubr.msk.bf16.vlgmr.msra.gmra.mxu1 %vm313_vm0, %v660_v28  ;;  %v604_v35 = vmul.f32 %v1160_v31, %v600_v34 }
 0x20b   : > { %v1162_v32 = vpop.eup %1161 }
 0x20c   : > { %v1164_v33 = vpop.eup %1163  ;;  %v606_v43 = vmul.f32 %v1162_v32, %v602_v41 }
 0x20d   : > { %v607_v48 = vmul.f32 %v1164_v33, %v603_v45 }
 0x210   : > { %640 = vperm.xlu0 %1147, %v1158_v30  }
 0x213   : > { %635 = vperm.xlu1 %1148, %v1160_v31  }
 0x217   : > { %645 = vperm.xlu1 %1148, %v1162_v32  }
 0x21b   : > { %650 = vperm.xlu1 %1148, %v1164_v33  }
 0x27f   : > { %v610_v36 = vpop.xlane.xlu1 %609 }
 0x280   : > { %v620_v38 = vadd.f32 %v610_v36, %v604_v35 }
 0x282   : > { %625 = vst.msk [vmem:[#allocation3] sm:$0xff] %vm304_vm2, %v620_v38 }
 0x283   : > { %v613_v40 = vpop.xlane.xlu0 %612 }
 0x284   : > { %v621_v42 = vadd.f32 %v613_v40, %v605_v39 }
 0x286   : > { %626 = vst.msk [vmem:[#allocation3 + $0x8] sm:$0xff] %vm304_vm2, %v621_v42 }
 0x287   : > { %v616_v44 = vpop.xlane.xlu1 %615 }
 0x288   : > { %v622_v46 = vadd.f32 %v616_v44, %v606_v43 }
 0x289   : > { %v865_v47 = vld [vmem:[#allocation3] sm:$0xff] }
 0x28a   : > { %627 = vst.msk [vmem:[#allocation3 + $0x10] sm:$0xff] %vm304_vm2, %v622_v46  ;;  %1165 = vrcp.f32 %v865_v47 }
 0x28b   : > { %v619_v49 = vpop.xlane.xlu1 %618  ;;  %v641_v62 = vpop.permute.xlu0 %640 }
 0x28c   : > { %v623_v50 = vadd.f32 %v619_v49, %v607_v48  ;;  %v654_v4 = vmul.f32 %v641_v62, %v630_v61 }
 0x28d   : > { %v866_v51 = vld [vmem:[#allocation3 + $0x8] sm:$0xff] }
 0x28e   : > { %628 = vst.msk [vmem:[#allocation3 + $0x18] sm:$0xff] %vm304_vm2, %v623_v50  ;;  %1167 = vrcp.f32 %v866_v51 }
 0x28f   : > { %v636_v58 = vpop.permute.xlu1 %635 }
 0x290   : > { %v653_v60 = vmul.f32 %v636_v58, %v629_v59 }
 0x291   : > { %v867_v52 = vld [vmem:[#allocation3 + $0x10] sm:$0xff] }
 0x292   : > { %1169 = vrcp.f32 %v867_v52 }
 0x293   : > { %v646_v1 = vpop.permute.xlu1 %645 }
 0x294   : > { %v655_v11 = vmul.f32 %v646_v1, %v631_v5 }
 0x295   : > { %v868_v53 = vld [vmem:[#allocation3 + $0x18] sm:$0xff] }
 0x296   : > { %1171 = vrcp.f32 %v868_v53 }
 0x297   : > { %v1166_v54 = vpop.eup %1165  ;;  %v651_v12 = vpop.permute.xlu1 %650 }
 0x298   : > { %875 = vperm.xlu1 %1148, %v1166_v54   ;;  %v656_v19 = vmul.f32 %v651_v12, %v632_v13 }
 0x29b   : > { %v1168_v55 = vpop.eup %1167 }
 0x29c   : > { %880 = vperm.xlu0 %1147, %v1168_v55  }
 0x29f   : > { %v1170_v56 = vpop.eup %1169 }
 0x2a0   : > { %885 = vperm.xlu1 %1148, %v1170_v56  }
 0x2a3   : > { %v1172_v57 = vpop.eup %1171 }
 0x2a4   : > { %890 = vperm.xlu0 %1147, %v1172_v57  }
 0x2b7   : > { %v702_v63 = vpop.f32.mrf.mxu0 }
 0x2b8   : > { %v846_v2 = vadd.f32 %v702_v63, %v653_v60 }
 0x2b9   : > { %v1099_v3 = vpop.f32.mrf.mxu0 }
 0x2ba   : > { %850 = vst.msk [vmem:[#allocation4] sm:$0xff] %vm313_vm0, %v846_v2 }
 0x2bb   : > { %v705_v6 = vpop.f32.mrf.mxu0  ;;  %v748_v7 = vpop.f32.mrf.mxu1 }
 0x2bc   : > { %v847_v8 = vadd.f32 %v748_v7, %v654_v4 }
 0x2bd   : > { %v1100_v9 = vpop.f32.mrf.mxu0  ;;  %v1105_v10 = vpop.f32.mrf.mxu1 }
 0x2be   : > { %851 = vst.msk [vmem:[#allocation4 + $0x8] sm:$0xff] %vm313_vm0, %v847_v8 }
 0x2bf   : > { %v751_v14 = vpop.f32.mrf.mxu1  ;;  %v794_v15 = vpop.f32.mrf.mxu0 }
 0x2c0   : > { %v848_v16 = vadd.f32 %v794_v15, %v655_v11 }
 0x2c1   : > { %v1106_v17 = vpop.f32.mrf.mxu1  ;;  %v1111_v18 = vpop.f32.mrf.mxu0  ;;  %v861_v28 = vld [vmem:[#allocation4] sm:$0xff] }
 0x2c2   : > { %852 = vst.msk [vmem:[#allocation4 + $0x10] sm:$0xff] %vm313_vm0, %v848_v16 }
 0x2c3   : > { %v797_v20 = vpop.f32.mrf.mxu0  ;;  %v840_v21 = vpop.f32.mrf.mxu1 }
 0x2c4   : > { %v849_v22 = vadd.f32 %v840_v21, %v656_v19 }
 0x2c5   : > { %v1112_v23 = vpop.f32.mrf.mxu0  ;;  %v1117_v24 = vpop.f32.mrf.mxu1  ;;  %v862_v30 = vld [vmem:[#allocation4 + $0x8] sm:$0xff] }
 0x2c6   : > { %853 = vst.msk [vmem:[#allocation4 + $0x18] sm:$0xff] %vm313_vm0, %v849_v22 }
 0x2c7   : > { %v843_v25 = vpop.f32.mrf.mxu1 }
 0x2c9   : > { %v1118_v26 = vpop.f32.mrf.mxu1  ;;  %v863_v35 = vld [vmem:[#allocation4 + $0x10] sm:$0xff] }
 0x2cd   : > { %v864_v39 = vld [vmem:[#allocation4 + $0x18] sm:$0xff] }
 0x313   : > { %v876_v27 = vpop.permute.xlu1 %875 }
 0x314   : > { %v893_v0 = vmul.f32 %v876_v27, %v861_v28 }
 0x316   : > { %v897_v29 = vpack.c.bf16 %v893_v0, %v893_v0 }
 0x317   : > { %v881_v31 = vpop.permute.xlu0 %880 }
 0x318   : > { %902 = vst.msk [vmem:[%s298_s28] sm:$0xf] %vm901_vm5, %v897_v29  ;;  %v894_v32 = vmul.f32 %v881_v31, %v862_v30 }
 0x31a   : > { %v898_v33 = vpack.c.bf16 %v894_v32, %v894_v32 }
 0x31b   : > { %v886_v34 = vpop.permute.xlu1 %885 }
 0x31c   : > { %903 = vst.msk [vmem:[%s298_s28 + $0x4] sm:$0xf] %vm901_vm5, %v898_v33  ;;  %v895_v36 = vmul.f32 %v886_v34, %v863_v35 }
 0x31e   : > { %v899_v37 = vpack.c.bf16 %v895_v36, %v895_v36 }
 0x31f   : > { %v891_v38 = vpop.permute.xlu0 %890 }
 0x320   : > { %904 = vst.msk [vmem:[%s298_s28 + $0x8] sm:$0xf] %vm901_vm5, %v899_v37  ;;  %v896_v40 = vmul.f32 %v891_v38, %v864_v39 }
 0x322   : > { %v900_v41 = vpack.c.bf16 %v896_v40, %v896_v40 }
 0x324   : > { %905 = vst.msk [vmem:[%s298_s28 + $0xc] sm:$0xf] %vm901_vm5, %v900_v41 }
 0x325 PF: > { %s13_s14 = sadd.s32 1, %s1195_s14   ;;  %s1412_s12 = smov %s1191_s13 }
 0x326   : > { %p10_p5 = scmp.ge.s32.totalorder %s13_s14, 4   ;;  %s1413_s13 = smov %s1415_s15 }
 0x328   :  { %12 = sbr.rel (!%p10_p5) target bundleno = 2 (0x2), region = 80 }

// kernel: transformer_block.5
= control target key start
LH: loop header
LB: loop body
LE: loop exit
PB: predicated region body
PF: predicated region fallthrough
CT: control target
= control target key end

     0   :  { %v532_v1 = vmov 0.0   ;;  %vm533_vm0 = vmmov 0   ;;  %vm65_vm1 = vcmask 261120   ;;  %s676_s0 = inlined_call_operand.vmem [shape: bf16[16,32], index: 0, kind: input, shape index: {}]   ;;  %s677_s1 = inlined_call_operand.vmem [shape: f32[16,32], index: 1, kind: input, shape index: {}]   ;;  %s678_s2 = inlined_call_operand.vmem [shape: f32[2,32], index: 2, kind: input, shape index: {}]   ;;  %s679_s3 = inlined_call_operand.vmem [shape: f32[2,32], index: 3, kind: input, shape index: {}]   ;;  %s680_s4 = inlined_call_operand.vmem [shape: f32[1,128], index: 4, kind: input, shape index: {}]   ;;  %s681_s5 = inlined_call_operand.vmem [shape: bf16[32,32], index: 5, kind: input, shape index: {}]   ;;  %s682_s6 = inlined_call_operand.vmem [shape: bf16[32,128], index: 6, kind: input, shape index: {}]   ;;  %s683_s7 = inlined_call_operand.vmem [shape: bf16[128,32], index: 7, kind: input, shape index: {}]   ;;  %s684_s8 = inlined_call_operand.hbm [shape: f32[16,32], index: 8, kind: output, shape index: {}]  }
   0x1   :  { %v488_v0 = vld [vmem:[%s681_s5 + $0x8] sm:$0xff]   ;;  %447 = vmatprep.subr.bf16.mxu1 %v532_v1  ;;  %463 = vmatprep.subr.bf16.mxu0 %v532_v1  ;;  %v489_v2 = vld [vmem:[%s681_s5] sm:$0xff]   ;;  %166 = vst.msk [vmem:[#allocation4] sm:$0xff] %vm65_vm1, %v532_v1  ;;  %167 = vst.msk [vmem:[#allocation4 + $0x8] sm:$0xff] %vm65_vm1, %v532_v1 }
   0x2   :  { %448 = vmatpush3.bf16.msra.mxu1 %v488_v0  ;;  %451 = vmatprep.mubr.msk.bf16.mxu1 %vm533_vm0, %v532_v1  ;;  %v490_v3 = vld [vmem:[%s676_s0] sm:$0xff]  }
   0x3   :  { %449 = vmatprep.subr.bf16.mxu1 %v532_v1  ;;  %479 = vmatprep.mubr.msk.bf16.mxu0 %vm533_vm0, %v532_v1 }
   0x6   :  { %450 = vmatpush3.bf16.msra.mxu1 %v489_v2 }
   0x7   :  { %455 = vmatprep.subr.bf16.mxu1 %v532_v1 }
   0x9   :  { %452 = vmatmul.mubr.msk.bf16.vlgmr.msra.gmra.mxu1 %vm65_vm1, %v490_v3 }
   0xa   :  { %459 = vmatprep.mubr.msk.bf16.mxu1 %vm533_vm0, %v532_v1 }
   0xb   :  { %13 = vsyncpa [#allocation6], 0  ;;  %v407_v4 = vld [vmem:[%s679_s3] ss:$0 sm:$0xff]  ;;  %v36_v10 = vld [vmem:[%s677_s1 + $0x8] sm:$0xff]  ;;  %vm163_vm2 = vcmask 257024  }
   0xc   :  { %v35_v5 = vld [vmem:[%s677_s1] sm:$0xff]  ;;  %v491_v27 = vld [vmem:[%s682_s6 + $0x8] sm:$0xff]   ;;  %v494_v48 = vld [vmem:[%s683_s7 + $0x38] sm:$0xff]   ;;  %s534_s14 = smov [#allocation5]  }
   0xd   :  { %456 = vmatpush3.bf16.msra.mxu1 %v491_v27  ;;  %v492_v28 = vld [vmem:[%s682_s6] sm:$0xff]   ;;  %464 = vmatpush3.bf16.msra.mxu0 %v494_v48  ;;  %v495_v49 = vld [vmem:[%s683_s7 + $0x30] sm:$0xff]   ;;  %v496_v50 = vld [vmem:[%s683_s7 + $0x28] sm:$0xff]   ;;  %s396_s1 = sshll.u32 %s534_s14, 4  ;;  %s397_s1 = int_to_ptr.vmem [resolvable:$true] %s396_s1 }
   0xe   :  { %457 = vmatprep.subr.bf16.mxu1 %v532_v1  ;;  %v412_v36 = vld [vmem:[%s678_s2] ss:$0 sm:$0xff]  ;;  %v413_v38 = vld [vmem:[%s678_s2 + $0x1] ss:$0 sm:$0xff]  ;;  %465 = vmatprep.subr.bf16.mxu0 %v532_v1  ;;  %v498_v52 = vld [vmem:[%s683_s7 + $0x18] sm:$0xff]   ;;  %s510_s15 = scalar_lea.vmem %s397_s1, 256  ;;  %p515_p1 = scmp.lt.s32.totalorder %s397_s1, %s397_s1 }
   0xf   :  { %v497_v51 = vld [vmem:[%s683_s7 + $0x20] sm:$0xff]   ;;  %v499_v53 = vld [vmem:[%s683_s7 + $0x10] sm:$0xff]   ;;  %v500_v54 = vld [vmem:[%s683_s7 + $0x8] sm:$0xff]   ;;  %p511_p0 = scmp.ne.s32.totalorder %s397_s1, %s510_s15  ;;  %p516_p2 = scmp.lt.s32.totalorder %s510_s15, %s510_s15 }
  0x10   :  { %v501_v55 = vld [vmem:[%s683_s7] sm:$0xff]  }
  0x11   :  { %458 = vmatpush3.bf16.msra.mxu1 %v492_v28  ;;  %466 = vmatpush3.bf16.msra.mxu0 %v495_v49  ;;  %v416_v56 = vld [vmem:[%s680_s4] ss:$0 sm:$0xff]  ;;  %v429_v28 = vld [vmem:[%s679_s3 + $0x1] ss:$0 sm:$0xff]  ;;  %p517_p3 = por %p516_p2, %p515_p1 }
  0x12   :  { %467 = vmatprep.subr.bf16.mxu0 %v532_v1 }
  0x13   :  { %p518_p4 = pnand %p517_p3, %p511_p0 }
  0x15   :  { %468 = vmatpush3.bf16.msra.mxu0 %v496_v50 }
  0x16   :  { %469 = vmatprep.subr.bf16.mxu0 %v532_v1 }
  0x19   :  { %470 = vmatpush3.bf16.msra.mxu0 %v497_v51 }
  0x1a   :  { %471 = vmatprep.subr.bf16.mxu0 %v532_v1 }
  0x1d   :  { %472 = vmatpush3.bf16.msra.mxu0 %v498_v52 }
  0x1e   :  { %473 = vmatprep.subr.bf16.mxu0 %v532_v1 }
  0x21   :  { %474 = vmatpush3.bf16.msra.mxu0 %v499_v53 }
  0x22   :  { %475 = vmatprep.subr.bf16.mxu0 %v532_v1 }
  0x25   :  { %476 = vmatpush3.bf16.msra.mxu0 %v500_v54 }
  0x26   :  { %477 = vmatprep.subr.bf16.mxu0 %v532_v1 }
  0x29   :  { %478 = vmatpush3.bf16.msra.mxu0 %v501_v55 }
  0xc9   :  { %v103_v6 = vpop.f32.mrf.mxu1 }
  0xca   :  { %v104_v7 = vadd.f32 %v407_v4, %v103_v6 }
  0xcb   :  { %v453_v8 = vpop.f32.mrf.mxu1 }
  0xcc   :  { %v110_v9 = vadd.f32 %v104_v7, %v35_v5 }
  0xcd   :  { %v106_v11 = vpop.f32.mrf.mxu1 }
  0xce   :  { %112 = vst.msk [vmem:[#allocation2] sm:$0xff] %vm65_vm1, %v110_v9  ;;  %v107_v12 = vadd.f32 %v407_v4, %v106_v11  ;;  %v116_v13 = vsel %vm65_vm1, %v110_v9, 0.0 }
  0xcf   :  { %v454_v14 = vpop.f32.mrf.mxu1  ;;  %117 = vadd.xlane.f32.xlu0 %v116_v13 }
  0xd0   :  { %v111_v15 = vadd.f32 %v107_v12, %v36_v10 }
  0xd2   :  { %113 = vst.msk [vmem:[#allocation2 + $0x8] sm:$0xff] %vm65_vm1, %v111_v15  ;;  %v119_v16 = vsel %vm65_vm1, %v111_v15, 0.0 }
  0xd3   :  { %120 = vadd.xlane.f32.xlu0 %v119_v16 }
 0x158   :  { %v118_v17 = vpop.xlane.xlu0 %117 }
 0x159   :  { %v123_v18 = vmul.f32 0.03125, %v118_v17 }
 0x15b   :  { %v125_v19 = vsub.f32 %v110_v9, %v123_v18  ;;  %v262_v18 = vld [vmem:[#allocation4] sm:$0xff] }
 0x15c   :  { %v121_v20 = vpop.xlane.xlu0 %120 }
 0x15d   :  { %v124_v21 = vmul.f32 0.03125, %v121_v20  ;;  %v127_v22 = vmul.f32 %v125_v19, %v125_v19 }
 0x15f   :  { %v126_v23 = vsub.f32 %v111_v15, %v124_v21  ;;  %v129_v24 = vsel %vm65_vm1, %v127_v22, 0.0  ;;  %v263_v22 = vld [vmem:[#allocation4 + $0x8] sm:$0xff] }
 0x160   :  { %130 = vadd.xlane.f32.xlu1 %v129_v24 }
 0x161   :  { %v128_v25 = vmul.f32 %v126_v23, %v126_v23 }
 0x163   :  { %v132_v26 = vsel %vm65_vm1, %v128_v25, 0.0 }
 0x164   :  { %133 = vadd.xlane.f32.xlu1 %v132_v26  ;;  %v376_v26 = vld [vmem:[#allocation2] sm:$0xff] }
 0x1e9   :  { %v131_v29 = vpop.xlane.xlu1 %130 }
 0x1ea   :  { %v135_v30 = vmul.f32 0.03125, %v131_v29 }
 0x1ec   :  { %v137_v31 = vadd.f32 1e-05, %v135_v30 }
 0x1ed   :  { %v134_v32 = vpop.xlane.xlu1 %133 }
 0x1ee   :  { %502 = vrsqrt.f32 %v137_v31  ;;  %v136_v33 = vmul.f32 0.03125, %v134_v32  ;;  %v377_v31 = vld [vmem:[#allocation2 + $0x8] sm:$0xff] }
 0x1f0   :  { %v138_v34 = vadd.f32 1e-05, %v136_v33 }
 0x1f2   :  { %504 = vrsqrt.f32 %v138_v34 }
 0x1fb   :  { %v503_v35 = vpop.eup %502 }
 0x1fc   :  { %v141_v37 = vmul.f32 %v503_v35, %v125_v19 }
 0x1fe   :  { %v147_v39 = vmul.f32 %v412_v36, %v141_v37 }
 0x1ff   :  { %v505_v40 = vpop.eup %504 }
 0x200   :  { %v153_v41 = vadd.f32 %v413_v38, %v147_v39  ;;  %v142_v42 = vmul.f32 %v505_v40, %v126_v23 }
 0x202   :  { %v430_v43 = vpack.c.bf16 %v153_v41, %v153_v41  ;;  %v148_v44 = vmul.f32 %v412_v36, %v142_v42 }
 0x204   :  { %164 = vst.msk [vmem:[#allocation3] sm:$0xf] %vm163_vm2, %v430_v43  ;;  %v154_v45 = vadd.f32 %v413_v38, %v148_v44 }
 0x206   :  { %v431_v46 = vpack.c.bf16 %v154_v45, %v154_v45 }
 0x208   :  { %165 = vst.msk [vmem:[#allocation3 + $0x4] sm:$0xf] %vm163_vm2, %v431_v46 }
 0x20f   :  { %v493_v47 = vld [vmem:[#allocation3] sm:$0xff]  }
 0x210   :  { %460 = vmatmul.mubr.msk.bf16.vlgmr.msra.gmra.mxu1 %vm65_vm1, %v493_v47 }
 0x2d0   :  { %v236_v57 = vpop.f32.mrf.mxu1 }
 0x2d1   :  { %v237_v58 = vadd.f32 %v416_v56, %v236_v57 }
 0x2d2   :  { %v461_v59 = vpop.f32.mrf.mxu1 }
 0x2d3   :  { %v245_v60 = vmul.f32 0.044715, %v237_v58  ;;  %v243_v12 = vmul.f32 0.5, %v237_v58 }
 0x2d4   :  { %v239_v61 = vpop.f32.mrf.mxu1 }
 0x2d5   :  { %v247_v62 = vmul.f32 %v245_v60, %v237_v58  ;;  %v240_v63 = vadd.f32 %v416_v56, %v239_v61 }
 0x2d6   :  { %v462_v0 = vpop.f32.mrf.mxu1 }
 0x2d7   :  { %v249_v2 = vmul.f32 %v247_v62, %v237_v58  ;;  %v246_v3 = vmul.f32 0.044715, %v240_v63  ;;  %v244_v13 = vmul.f32 0.5, %v240_v63 }
 0x2d9   :  { %v248_v4 = vmul.f32 %v246_v3, %v240_v63  ;;  %v251_v5 = vadd.f32 %v249_v2, %v237_v58 }
 0x2db   :  { %v250_v6 = vmul.f32 %v248_v4, %v240_v63  ;;  %v253_v7 = vmul.f32 0.7978846, %v251_v5 }
 0x2dd   :  { %v252_v1 = vadd.f32 %v250_v6, %v240_v63  ;;  %506 = vtanh.f32 %v253_v7 }
 0x2df   :  { %v254_v8 = vmul.f32 0.7978846, %v252_v1 }
 0x2e1   :  { %508 = vtanh.f32 %v254_v8 }
 0x2ea   :  { %v507_v9 = vpop.eup %506 }
 0x2eb   :  { %v257_v10 = vadd.f32 1.0, %v507_v9 }
 0x2ed   :  { %v259_v15 = vmul.f32 %v257_v10, %v243_v12 }
 0x2ee   :  { %v509_v11 = vpop.eup %508 }
 0x2ef   :  { %v258_v14 = vadd.f32 1.0, %v509_v11 }
 0x2f1   :  { %v260_v16 = vmul.f32 %v258_v14, %v244_v13 }
 0x2f3   :  { %v261_v17 = vpack.c.bf16 %v260_v16, %v259_v15 }
 0x2f5   :  { %480 = vmatmul.mubr.bf16.vlgmr.msra.gmra.mxu0 %v261_v17 }
 0x3b5   :  { %v362_v19 = vpop.f32.mrf.mxu0 }
 0x3b6   :  { %v369_v20 = vadd.f32 %v362_v19, %v262_v18 }
 0x3b7   :  { %v481_v21 = vpop.f32.mrf.mxu0 }
 0x3b8   :  { %371 = vst.msk [vmem:[#allocation4] sm:$0xff] %vm65_vm1, %v369_v20 }
 0x3b9   :  { %v365_v23 = vpop.f32.mrf.mxu0 }
 0x3ba   :  { %v370_v24 = vadd.f32 %v365_v23, %v263_v22 }
 0x3bb   :  { %v482_v25 = vpop.f32.mrf.mxu0 }
 0x3bc   :  { %372 = vst.msk [vmem:[#allocation4 + $0x8] sm:$0xff] %vm65_vm1, %v370_v24 }
 0x3bf   :  { %v378_v27 = vld [vmem:[#allocation4] sm:$0xff] }
 0x3c0   :  { %v380_v29 = vadd.f32 %v378_v27, %v376_v26 }
 0x3c2   :  { %v387_v30 = vadd.f32 %v429_v28, %v380_v29 }
 0x3c3   :  { %v379_v32 = vld [vmem:[#allocation4 + $0x8] sm:$0xff] }
 0x3c4   :  { %v381_v33 = vadd.f32 %v379_v32, %v377_v31  ;;  %389 = vst.msk [vmem:[#allocation5] sm:$0xff] %vm65_vm1, %v387_v30 }
 0x3c6   :  { %v388_v34 = vadd.f32 %v429_v28, %v381_v33 }
 0x3c8   :  { %390 = vst.msk [vmem:[#allocation5 + $0x8] sm:$0xff] %vm65_vm1, %v388_v34 }
 0x3c9   :  { %521 = shalt.err (!%p518_p4)
}
 0x3ca   :  { %s535_s3 = smov 128   ;;  %s536_s16 = smov 8  }
 0x3cb   :  { %402 = dma.vmem_to_hbm [thread:$0]  %s397_s1, 256, %s684_s8, [#allocation6], %s535_s3, %s535_s3, %s536_s16  }
 0x3cc   :  { %530 = dma.done.wait [#allocation6], 256  }
 0x3cd   :  { %531 = vsyncadd [#allocation6], 4294967040 }
 0x3ce   :  { %406 = vsyncpa [#allocation6], 1 }

</bundles_post_ra>
